<compile_context>
chip_gen: v7x
topology: tpu7x:2x2x1
jax: 0.10.0
libtpu: 0.0.40
codegen_flags: <defaults>
</compile_context>

<pallas_src>
import functools

import jax
import jax.numpy as jnp
import numpy as np
from jax import lax
from jax.experimental import pallas as pl
from jax.experimental.pallas import tpu as pltpu


def make_divisible(v, divisor, min_val=None):
    if min_val is None:
        min_val = divisor
    new_v = max(min_val, int(v + divisor / 2) // divisor * divisor)
    if new_v < 0.9 * v:
        new_v += divisor
    return new_v


def _default_batch_block(B):
    """Batch elements per grid step: fold B on single-TC chips, keep a parallel
    batch axis on dual-TensorCore chips (v7x)."""
    try:
        kind = jax.devices()[0].device_kind.lower()
    except Exception:
        kind = ""
    if any(tag in kind for tag in ("v7", "tpu7", "7x")):
        return 1 if B > 1 else B
    return B


# ----------------------------------------------------------------------------
# Fused kernel. Everything is lane-dense: rows = batch*height, lanes = width*channels.
# ----------------------------------------------------------------------------
def mbv3_kernel(x_ref, w1_ref, b1_ref, wdw_ref, b2_ref, w3_ref, b3_ref, o_ref, *,
                H, W, C, C_inner, C_out, K, stride, expansion, has_shortcut,
                activation, Bt, mxu_dtype):
    pad = K // 2
    R = Bt * H                              # rows per grid step
    Wld = W * C_inner                       # lane-dense width (pre-decimation)
    H_out = (H + 2 * pad - K) // stride + 1
    W_out = (W + 2 * pad - K) // stride + 1
    R_out = Bt * H_out
    Wld_out = W_out * C_inner

    def act(v):
        if activation == 'relu':
            return jnp.maximum(v, 0.0)
        # h-swish (MobileNetV3)
        return v * jnp.clip(v + 3.0, 0.0, 6.0) * (1.0 / 6.0)

    x_ld = x_ref[...]                       # (R, W*C), f32, lane-dense

    # ---- inv_bottleneck: 1x1 conv as a block-diagonal matmul on the dense slab -------
    if expansion != 1:
        h_ld = act(jnp.dot(x_ld.astype(mxu_dtype), w1_ref[...],
                           preferred_element_type=jnp.float32) + b1_ref[...])
    else:
        h_ld = x_ld                         # C_inner == C

    # ---- depth_wise: KxK depthwise conv, register-resident ---------------------------
    # kh taps: sublane roll + row-validity mask (also masks batch-image boundaries when
    # the batch is folded into the row axis).  kw taps: lane roll by dw*C_inner; the
    # w-boundary mask is folded into the per-tap weights (wdw_ref) in the wrapper.
    row = lax.broadcasted_iota(jnp.int32, (R, 1), 0)
    if Bt == 1:
        r_in = row
    elif (H & (H - 1)) == 0:
        r_in = lax.bitwise_and(row, H - 1)
    else:
        r_in = lax.rem(row, H)

    acc = jnp.zeros((R, Wld), jnp.float32)
    for kh in range(K):
        dh = kh - pad
        if dh == 0:
            h_kh = h_ld
        else:
            rolled = pltpu.roll(h_ld, (-dh) % R, axis=0)      # rows <- rows + dh
            ok = (r_in < H - dh) if dh > 0 else (r_in >= -dh)
            h_kh = jnp.where(ok, rolled, 0.0)
        for kw in range(K):
            dw = kw - pad
            if dw == 0:
                tap = h_kh
            else:
                tap = pltpu.roll(h_kh, (-dw * C_inner) % Wld, axis=1)  # w <- w + dw
            w_tap = wdw_ref[pl.ds(kh * K + kw, 1), :]          # (1, Wld), kw mask folded
            acc = acc + tap * w_tap

    if stride == 1:
        d_pre = acc
    else:
        # Decimate once after accumulation (stride>1 blocks never take the residual).
        d_pre = (acc.reshape(R_out, stride, Wld)[:, 0, :]
                    .reshape(R_out, W_out, stride, C_inner)[:, :, 0, :]
                    .reshape(R_out, Wld_out))

    d_ld = act(d_pre + b2_ref[...])

    # TODO(synk): squeeze-excite (use_se=True) not implemented; default use_se=False.

    # ---- point_linear: 1x1 conv as a block-diagonal matmul, no activation ------------
    out_ld = jnp.dot(d_ld.astype(mxu_dtype), w3_ref[...],
                     preferred_element_type=jnp.float32) + b3_ref[...]

    if has_shortcut:
        # stride==1 and C==C_out, so the lane-dense layouts match exactly.
        out_ld = out_ld + x_ld
    # TODO(synk): drop_connect (stochastic depth) is a no-op at drop_connect_rate=0.

    o_ref[...] = out_ld.astype(o_ref.dtype)


# ----------------------------------------------------------------------------
# Wrapper: layout plumbing + BN folding + block-diagonal / lane-dense weight prep.
# ----------------------------------------------------------------------------
def mobilenetv3_block(x_nchw, params, *, expansion, kernel_size, stride,
                      C, C_out, C_inner, activation='relu', use_se=False,
                      mxu_dtype=jnp.float32, batch_block=None):
    assert not use_se, "SE module not implemented in the Pallas kernel"
    w1, s1, b1, wdw, s2, b2, w3, s3, b3 = params
    if expansion == 1:
        assert C_inner == C, "expansion==1 requires C_inner == C"
    has_shortcut = (stride == 1 and C == C_out)

    K = kernel_size
    pad = K // 2
    B, _, H, W = x_nchw.shape
    H_out = (H + 2 * pad - K) // stride + 1
    W_out = (W + 2 * pad - K) // stride + 1
    if stride != 1:
        assert H % stride == 0 and W % stride == 0
        assert H_out == H // stride and W_out == W // stride

    f32 = jnp.float32
    # NCHW -> NHWC -> lane-dense slab (B*H, W*C): unmasked full-width vst in-kernel.
    x_ld = jnp.transpose(x_nchw, (0, 2, 3, 1)).reshape(B * H, W * C).astype(f32)

    # Fold BN scales into conv weights; build block-diagonal 1x1 weights so the
    # matmuls operate directly on the lane-dense layout (lane = w*C + c).
    w1s = (w1 * s1).astype(f32)                               # (C, C_inner)
    w3s = (w3 * s3).astype(f32)                               # (C_inner, C_out)
    w1_blk = (jnp.einsum('uv,cd->ucvd', jnp.eye(W, dtype=f32), w1s)
              .reshape(W * C, W * C_inner).astype(mxu_dtype))
    w3_blk = (jnp.einsum('uv,cd->ucvd', jnp.eye(W_out, dtype=f32), w3s)
              .reshape(W_out * C_inner, W_out * C_out).astype(mxu_dtype))

    # Depthwise weights: BN scale folded; per-tap lane-dense layout with the kw
    # (width-boundary) validity mask folded in so no in-kernel lane masking is needed.
    wdw_s = (wdw * s2.reshape(1, 1, C_inner)).astype(f32)     # (K, K, C_inner)
    w_idx = jnp.arange(W)
    taps = []
    for kh in range(K):
        for kw in range(K):
            dw = kw - pad
            lane_ok = ((w_idx + dw >= 0) & (w_idx + dw < W)).astype(f32)   # (W,)
            taps.append((lane_ok[:, None] * wdw_s[kh, kw][None, :]).reshape(W * C_inner))
    wdw_ld = jnp.stack(taps, axis=0)                          # (K*K, W*C_inner)

    # Biases pre-tiled to the lane-dense layout (hoisted broadcasts).
    b1_ld = jnp.tile(b1.reshape(1, C_inner).astype(f32), (1, W))        # (1, W*C_inner)
    b2_ld = jnp.tile(b2.reshape(1, C_inner).astype(f32), (1, W_out))    # (1, W_out*C_inner)
    b3_ld = jnp.tile(b3.reshape(1, C_out).astype(f32), (1, W_out))      # (1, W_out*C_out)

    Bt = batch_block if batch_block is not None else _default_batch_block(B)
    assert B % Bt == 0
    G = B // Bt

    kern = functools.partial(
        mbv3_kernel, H=H, W=W, C=C, C_inner=C_inner, C_out=C_out, K=K,
        stride=stride, expansion=expansion, has_shortcut=has_shortcut,
        activation=activation, Bt=Bt, mxu_dtype=mxu_dtype)

    def const_spec(arr):
        nd = arr.ndim
        return pl.BlockSpec(arr.shape, lambda i, _n=nd: (0,) * _n)

    out_ld = pl.pallas_call(
        kern,
        out_shape=jax.ShapeDtypeStruct((B * H_out, W_out * C_out), x_nchw.dtype),
        grid_spec=pltpu.PrefetchScalarGridSpec(
            num_scalar_prefetch=0,
            grid=(G,),
            in_specs=[
                pl.BlockSpec((Bt * H, W * C), lambda i: (i, 0)),
                const_spec(w1_blk), const_spec(b1_ld),
                const_spec(wdw_ld), const_spec(b2_ld),
                const_spec(w3_blk), const_spec(b3_ld),
            ],
            out_specs=pl.BlockSpec((Bt * H_out, W_out * C_out), lambda i: (i, 0)),
        ),
        compiler_params=pltpu.CompilerParams(
            dimension_semantics=("parallel",)),
    )(x_ld, w1_blk, b1_ld, wdw_ld, b2_ld, w3_blk, b3_ld)

    out = out_ld.reshape(B, H_out, W_out, C_out)
    return jnp.transpose(out, (0, 3, 1, 2))                   # NHWC -> NCHW


# ----------------------------------------------------------------------------
# Pure-JAX reference (for verification); honors the activation argument.
# ----------------------------------------------------------------------------
def reference(x_nchw, params, *, expansion, kernel_size, stride, C, C_out, C_inner,
              activation='relu'):
    w1, s1, b1, wdw, s2, b2, w3, s3, b3 = params
    pad = kernel_size // 2

    def act(v):
        if activation == 'relu':
            return jnp.maximum(v, 0.0)
        return v * jnp.clip(v + 3.0, 0.0, 6.0) * (1.0 / 6.0)

    x = jnp.transpose(x_nchw, (0, 2, 3, 1)).astype(jnp.float32)
    h = x
    if expansion != 1:
        h = jnp.einsum('bhwc,cd->bhwd', x, w1)
        h = act(h * s1.reshape(1, 1, 1, -1) + b1.reshape(1, 1, 1, -1))
    dw_filter = wdw.reshape(kernel_size, kernel_size, 1, C_inner)
    d = lax.conv_general_dilated(
        h, dw_filter, window_strides=(stride, stride),
        padding=[(pad, pad), (pad, pad)],
        dimension_numbers=('NHWC', 'HWIO', 'NHWC'),
        feature_group_count=C_inner)
    d = act(d * s2.reshape(1, 1, 1, -1) + b2.reshape(1, 1, 1, -1))
    out = jnp.einsum('bhwc,cd->bhwd', d, w3)
    out = out * s3.reshape(1, 1, 1, -1) + b3.reshape(1, 1, 1, -1)
    if stride == 1 and C == C_out:
        out = out + x
    return jnp.transpose(out, (0, 3, 1, 2))


# ----------------------------------------------------------------------------
def fold_bn(kg, kb, km, kv, n):
    gamma = jax.random.normal(kg, (n,), jnp.float32) * 0.1 + 1.0
    beta = jax.random.normal(kb, (n,), jnp.float32) * 0.1
    mean = jax.random.normal(km, (n,), jnp.float32) * 0.1
    var = jax.random.uniform(kv, (n,), jnp.float32, minval=0.5, maxval=1.5)
    scale = gamma / jnp.sqrt(var + 1e-5)
    bias = beta - mean * scale
    return scale.reshape(1, n), bias.reshape(1, n)


def make_params(key, C, C_inner, C_out, K):
    ks = jax.random.split(key, 15)
    w1 = jax.random.normal(ks[0], (C, C_inner), jnp.float32) * 0.2
    s1, b1 = fold_bn(ks[1], ks[2], ks[3], ks[4], C_inner)
    wdw = jax.random.normal(ks[5], (K, K, C_inner), jnp.float32) * 0.2
    s2, b2 = fold_bn(ks[6], ks[7], ks[8], ks[9], C_inner)
    w3 = jax.random.normal(ks[10], (C_inner, C_out), jnp.float32) * 0.2
    s3, b3 = fold_bn(ks[11], ks[12], ks[13], ks[14], C_out)
    return (w1, s1, b1, wdw, s2, b2, w3, s3, b3)


if __name__ == "__main__":
    key = jax.random.PRNGKey(0)
    k1, k2, k3, k4 = jax.random.split(key, 4)
    B, H, W, K = 2, 16, 16, 3

    # ---- Config 1: expansion=4, ReLU, stride=1 (standard MobileNetV3 block) ----------
    expansion, C, C_out, stride = 4, 8, 8, 1
    C_inner = make_divisible(C * expansion, 8)       # 32
    x = jax.random.normal(k1, (B, C, H, W), jnp.float32)
    params = make_params(k2, C, C_inner, C_out, K)
    cfg = dict(expansion=expansion, kernel_size=K, stride=stride,
               C=C, C_out=C_out, C_inner=C_inner)

    out = jax.block_until_ready(mobilenetv3_block(x, params, activation='relu', **cfg))
    ref = jax.block_until_ready(reference(x, params, activation='relu', **cfg))
    np.testing.assert_allclose(np.asarray(out), np.asarray(ref), rtol=1e-4, atol=1e-4)

    # ---- Config 2: expansion=1 (no expand conv), h-swish ------------------------------
    expansion2, C2, C_out2 = 1, 8, 8
    C_inner2 = make_divisible(C2 * expansion2, 8)    # 8
    x2 = jax.random.normal(k3, (B, C2, H, W), jnp.float32)
    params2 = make_params(k4, C2, C_inner2, C_out2, K)
    cfg2 = dict(expansion=expansion2, kernel_size=K, stride=1,
                C=C2, C_out=C_out2, C_inner=C_inner2)
    out2 = jax.block_until_ready(mobilenetv3_block(x2, params2, activation='hswish', **cfg2))
    ref2 = jax.block_until_ready(reference(x2, params2, activation='hswish', **cfg2))
    np.testing.assert_allclose(np.asarray(out2), np.asarray(ref2), rtol=1e-4, atol=1e-4)

    # ---- Config 3: bf16 MXU operands (recommended on v6e/v7x), f32 accumulation -------
    out_bf16 = jax.block_until_ready(
        mobilenetv3_block(x, params, activation='relu', mxu_dtype=jnp.bfloat16, **cfg))
    np.testing.assert_allclose(np.asarray(out_bf16), np.asarray(ref), rtol=5e-2, atol=5e-2)

    print("KERNEL_OK")
</pallas_src>

<mosaic_0001>
module attributes {stable_mosaic.version = 11 : i64} {
  func.func @mbv3_kernel(%arg0: i32, %arg1: memref<32x128xf32, #tpu.memory_space<vmem>>, %arg2: memref<128x512xf32, #tpu.memory_space<vmem>>, %arg3: memref<1x512xf32, #tpu.memory_space<vmem>>, %arg4: memref<9x512xf32, #tpu.memory_space<vmem>>, %arg5: memref<1x512xf32, #tpu.memory_space<vmem>>, %arg6: memref<512x128xf32, #tpu.memory_space<vmem>>, %arg7: memref<1x128xf32, #tpu.memory_space<vmem>>, %arg8: memref<32x128xf32, #tpu.memory_space<vmem>>) attributes {dimension_semantics = [#tpu.dimension_semantics<parallel>], iteration_bounds = array<i64: 1>, scalar_prefetch = 0 : i64, scratch_operands = 0 : i64, tpu.core_type = #tpu.core_type<tc>, window_params = [{transform_indices = @transform_0, window_bounds = array<i64: 32, 128>}, {pipeline_mode = #tpu.pipeline_mode<synchronous>, transform_indices = @transform_1, window_bounds = array<i64: 128, 512>}, {pipeline_mode = #tpu.pipeline_mode<synchronous>, transform_indices = @transform_2, window_bounds = array<i64: 1, 512>}, {pipeline_mode = #tpu.pipeline_mode<synchronous>, transform_indices = @transform_3, window_bounds = array<i64: 9, 512>}, {pipeline_mode = #tpu.pipeline_mode<synchronous>, transform_indices = @transform_4, window_bounds = array<i64: 1, 512>}, {pipeline_mode = #tpu.pipeline_mode<synchronous>, transform_indices = @transform_5, window_bounds = array<i64: 512, 128>}, {pipeline_mode = #tpu.pipeline_mode<synchronous>, transform_indices = @transform_6, window_bounds = array<i64: 1, 128>}, {transform_indices = @transform_7, window_bounds = array<i64: 32, 128>}]} {
    %c0 = arith.constant 0 : index
    %c0_0 = arith.constant 0 : index
    %0 = vector.load %arg1[%c0, %c0_0] : memref<32x128xf32, #tpu.memory_space<vmem>>, vector<32x128xf32>
    %c0_1 = arith.constant 0 : index
    %c0_2 = arith.constant 0 : index
    %1 = vector.load %arg2[%c0_1, %c0_2] : memref<128x512xf32, #tpu.memory_space<vmem>>, vector<128x512xf32>
    %cst = arith.constant dense<0.000000e+00> : vector<32x512xf32>
    %2 = tpu.matmul %0, %1, %cst {dimension_numbers = #tpu.dot_dimension_numbers<[1], [0], [0], [1], [0, 0, 1, 1], [], []>} : vector<32x128xf32>, vector<128x512xf32>, vector<32x512xf32> -> vector<32x512xf32>
    %c0_3 = arith.constant 0 : index
    %c0_4 = arith.constant 0 : index
    %3 = vector.load %arg3[%c0_3, %c0_4] : memref<1x512xf32, #tpu.memory_space<vmem>>, vector<1x512xf32>
    %4 = vector.broadcast %3 : vector<1x512xf32> to vector<32x512xf32>
    %5 = arith.addf %2, %4 : vector<32x512xf32>
    %cst_5 = arith.constant 0.000000e+00 : f32
    %6 = vector.broadcast %cst_5 : f32 to vector<32x512xf32>
    %7 = arith.maximumf %5, %6 : vector<32x512xf32>
    %8 = tpu.iota {dimensions = array<i32: 0>} : vector<32x1xi32>
    %c15_i32 = arith.constant 15 : i32
    %9 = vector.broadcast %c15_i32 : i32 to vector<32x1xi32>
    %10 = arith.andi %8, %9 : vector<32x1xi32>
    %cst_6 = arith.constant 0.000000e+00 : f32
    %11 = vector.broadcast %cst_6 : f32 to vector<32x512xf32>
    %c1_i32 = arith.constant 1 : i32
    %12 = tpu.dynamic_rotate %7 by %c1_i32 dim 0 : vector<32x512xf32>, i32 -> vector<32x512xf32>
    %c1_i32_7 = arith.constant 1 : i32
    %13 = vector.broadcast %c1_i32_7 : i32 to vector<32x1xi32>
    %14 = arith.cmpi sge, %10, %13 : vector<32x1xi32>
    %cst_8 = arith.constant 0.000000e+00 : f32
    %15 = vector.shape_cast %14 : vector<32x1xi1> to vector<32x1xi1>
    %16 = vector.broadcast %15 : vector<32x1xi1> to vector<32x512xi1>
    %17 = vector.broadcast %cst_8 : f32 to vector<32x512xf32>
    %18 = arith.select %16, %12, %17 : vector<32x512xi1>, vector<32x512xf32>
    %c32_i32 = arith.constant 32 : i32
    %19 = tpu.dynamic_rotate %18 by %c32_i32 dim 1 : vector<32x512xf32>, i32 -> vector<32x512xf32>
    %c0_9 = arith.constant 0 : index
    %c0_10 = arith.constant 0 : index
    %20 = vector.load %arg4[%c0_9, %c0_10] : memref<9x512xf32, #tpu.memory_space<vmem>>, vector<1x512xf32>
    %21 = vector.broadcast %20 : vector<1x512xf32> to vector<32x512xf32>
    %22 = arith.mulf %19, %21 : vector<32x512xf32>
    %23 = arith.addf %11, %22 : vector<32x512xf32>
    %c1 = arith.constant 1 : index
    %c0_11 = arith.constant 0 : index
    %24 = vector.load %arg4[%c1, %c0_11] : memref<9x512xf32, #tpu.memory_space<vmem>>, vector<1x512xf32>
    %25 = vector.broadcast %24 : vector<1x512xf32> to vector<32x512xf32>
    %26 = arith.mulf %18, %25 : vector<32x512xf32>
    %27 = arith.addf %23, %26 : vector<32x512xf32>
    %c480_i32 = arith.constant 480 : i32
    %28 = tpu.dynamic_rotate %18 by %c480_i32 dim 1 : vector<32x512xf32>, i32 -> vector<32x512xf32>
    %c2 = arith.constant 2 : index
    %c0_12 = arith.constant 0 : index
    %29 = vector.load %arg4[%c2, %c0_12] : memref<9x512xf32, #tpu.memory_space<vmem>>, vector<1x512xf32>
    %30 = vector.broadcast %29 : vector<1x512xf32> to vector<32x512xf32>
    %31 = arith.mulf %28, %30 : vector<32x512xf32>
    %32 = arith.addf %27, %31 : vector<32x512xf32>
    %c32_i32_13 = arith.constant 32 : i32
    %33 = tpu.dynamic_rotate %7 by %c32_i32_13 dim 1 : vector<32x512xf32>, i32 -> vector<32x512xf32>
    %c3 = arith.constant 3 : index
    %c0_14 = arith.constant 0 : index
    %34 = vector.load %arg4[%c3, %c0_14] : memref<9x512xf32, #tpu.memory_space<vmem>>, vector<1x512xf32>
    %35 = vector.broadcast %34 : vector<1x512xf32> to vector<32x512xf32>
    %36 = arith.mulf %33, %35 : vector<32x512xf32>
    %37 = arith.addf %32, %36 : vector<32x512xf32>
    %c4 = arith.constant 4 : index
    %c0_15 = arith.constant 0 : index
    %38 = vector.load %arg4[%c4, %c0_15] : memref<9x512xf32, #tpu.memory_space<vmem>>, vector<1x512xf32>
    %39 = vector.broadcast %38 : vector<1x512xf32> to vector<32x512xf32>
    %40 = arith.mulf %7, %39 : vector<32x512xf32>
    %41 = arith.addf %37, %40 : vector<32x512xf32>
    %c480_i32_16 = arith.constant 480 : i32
    %42 = tpu.dynamic_rotate %7 by %c480_i32_16 dim 1 : vector<32x512xf32>, i32 -> vector<32x512xf32>
    %c5 = arith.constant 5 : index
    %c0_17 = arith.constant 0 : index
    %43 = vector.load %arg4[%c5, %c0_17] : memref<9x512xf32, #tpu.memory_space<vmem>>, vector<1x512xf32>
    %44 = vector.broadcast %43 : vector<1x512xf32> to vector<32x512xf32>
    %45 = arith.mulf %42, %44 : vector<32x512xf32>
    %46 = arith.addf %41, %45 : vector<32x512xf32>
    %c31_i32 = arith.constant 31 : i32
    %47 = tpu.dynamic_rotate %7 by %c31_i32 dim 0 : vector<32x512xf32>, i32 -> vector<32x512xf32>
    %c15_i32_18 = arith.constant 15 : i32
    %48 = vector.broadcast %c15_i32_18 : i32 to vector<32x1xi32>
    %49 = arith.cmpi slt, %10, %48 : vector<32x1xi32>
    %cst_19 = arith.constant 0.000000e+00 : f32
    %50 = vector.shape_cast %49 : vector<32x1xi1> to vector<32x1xi1>
    %51 = vector.broadcast %50 : vector<32x1xi1> to vector<32x512xi1>
    %52 = vector.broadcast %cst_19 : f32 to vector<32x512xf32>
    %53 = arith.select %51, %47, %52 : vector<32x512xi1>, vector<32x512xf32>
    %c32_i32_20 = arith.constant 32 : i32
    %54 = tpu.dynamic_rotate %53 by %c32_i32_20 dim 1 : vector<32x512xf32>, i32 -> vector<32x512xf32>
    %c6 = arith.constant 6 : index
    %c0_21 = arith.constant 0 : index
    %55 = vector.load %arg4[%c6, %c0_21] : memref<9x512xf32, #tpu.memory_space<vmem>>, vector<1x512xf32>
    %56 = vector.broadcast %55 : vector<1x512xf32> to vector<32x512xf32>
    %57 = arith.mulf %54, %56 : vector<32x512xf32>
    %58 = arith.addf %46, %57 : vector<32x512xf32>
    %c7 = arith.constant 7 : index
    %c0_22 = arith.constant 0 : index
    %59 = vector.load %arg4[%c7, %c0_22] : memref<9x512xf32, #tpu.memory_space<vmem>>, vector<1x512xf32>
    %60 = vector.broadcast %59 : vector<1x512xf32> to vector<32x512xf32>
    %61 = arith.mulf %53, %60 : vector<32x512xf32>
    %62 = arith.addf %58, %61 : vector<32x512xf32>
    %c480_i32_23 = arith.constant 480 : i32
    %63 = tpu.dynamic_rotate %53 by %c480_i32_23 dim 1 : vector<32x512xf32>, i32 -> vector<32x512xf32>
    %c8 = arith.constant 8 : index
    %c0_24 = arith.constant 0 : index
    %64 = vector.load %arg4[%c8, %c0_24] : memref<9x512xf32, #tpu.memory_space<vmem>>, vector<1x512xf32>
    %65 = vector.broadcast %64 : vector<1x512xf32> to vector<32x512xf32>
    %66 = arith.mulf %63, %65 : vector<32x512xf32>
    %67 = arith.addf %62, %66 : vector<32x512xf32>
    %c0_25 = arith.constant 0 : index
    %c0_26 = arith.constant 0 : index
    %68 = vector.load %arg5[%c0_25, %c0_26] : memref<1x512xf32, #tpu.memory_space<vmem>>, vector<1x512xf32>
    %69 = vector.broadcast %68 : vector<1x512xf32> to vector<32x512xf32>
    %70 = arith.addf %67, %69 : vector<32x512xf32>
    %cst_27 = arith.constant 0.000000e+00 : f32
    %71 = vector.broadcast %cst_27 : f32 to vector<32x512xf32>
    %72 = arith.maximumf %70, %71 : vector<32x512xf32>
    %c0_28 = arith.constant 0 : index
    %c0_29 = arith.constant 0 : index
    %73 = vector.load %arg6[%c0_28, %c0_29] : memref<512x128xf32, #tpu.memory_space<vmem>>, vector<512x128xf32>
    %cst_30 = arith.constant dense<0.000000e+00> : vector<32x128xf32>
    %74 = tpu.matmul %72, %73, %cst_30 {dimension_numbers = #tpu.dot_dimension_numbers<[1], [0], [0], [1], [0, 0, 1, 1], [], []>} : vector<32x512xf32>, vector<512x128xf32>, vector<32x128xf32> -> vector<32x128xf32>
    %c0_31 = arith.constant 0 : index
    %c0_32 = arith.constant 0 : index
    %75 = vector.load %arg7[%c0_31, %c0_32] : memref<1x128xf32, #tpu.memory_space<vmem>>, vector<1x128xf32>
    %76 = vector.broadcast %75 : vector<1x128xf32> to vector<32x128xf32>
    %77 = arith.addf %74, %76 : vector<32x128xf32>
    %78 = arith.addf %77, %0 : vector<32x128xf32>
    %c0_33 = arith.constant 0 : index
    %c0_34 = arith.constant 0 : index
    %79 = vector.load %arg8[%c0_33, %c0_34] : memref<32x128xf32, #tpu.memory_space<vmem>>, vector<32x128xf32>
    tpu.vector_store %arg8[%c0_33, %c0_34], %78 {strides = array<i32>} : memref<32x128xf32, #tpu.memory_space<vmem>>, vector<32x128xf32>,
    return
  }
  func.func @transform_0(%arg0: i32) -> (i32, i32) {
    %c0_i32 = arith.constant 0 : i32
    %c0_i32_0 = arith.constant 0 : i32
    return %arg0, %c0_i32 : i32, i32
  }
  func.func @transform_1(%arg0: i32) -> (i32, i32) {
    %c0_i32 = arith.constant 0 : i32
    %c0_i32_0 = arith.constant 0 : i32
    %c0_i32_1 = arith.constant 0 : i32
    return %c0_i32, %c0_i32_0 : i32, i32
  }
  func.func @transform_2(%arg0: i32) -> (i32, i32) {
    %c0_i32 = arith.constant 0 : i32
    %c0_i32_0 = arith.constant 0 : i32
    %c0_i32_1 = arith.constant 0 : i32
    return %c0_i32, %c0_i32_0 : i32, i32
  }
  func.func @transform_3(%arg0: i32) -> (i32, i32) {
    %c0_i32 = arith.constant 0 : i32
    %c0_i32_0 = arith.constant 0 : i32
    %c0_i32_1 = arith.constant 0 : i32
    return %c0_i32, %c0_i32_0 : i32, i32
  }
  func.func @transform_4(%arg0: i32) -> (i32, i32) {
    %c0_i32 = arith.constant 0 : i32
    %c0_i32_0 = arith.constant 0 : i32
    %c0_i32_1 = arith.constant 0 : i32
    return %c0_i32, %c0_i32_0 : i32, i32
  }
  func.func @transform_5(%arg0: i32) -> (i32, i32) {
    %c0_i32 = arith.constant 0 : i32
    %c0_i32_0 = arith.constant 0 : i32
    %c0_i32_1 = arith.constant 0 : i32
    return %c0_i32, %c0_i32_0 : i32, i32
  }
  func.func @transform_6(%arg0: i32) -> (i32, i32) {
    %c0_i32 = arith.constant 0 : i32
    %c0_i32_0 = arith.constant 0 : i32
    %c0_i32_1 = arith.constant 0 : i32
    return %c0_i32, %c0_i32_0 : i32, i32
  }
  func.func @transform_7(%arg0: i32) -> (i32, i32) {
    %c0_i32 = arith.constant 0 : i32
    %c0_i32_0 = arith.constant 0 : i32
    return %arg0, %c0_i32 : i32, i32
  }
}

</mosaic_0001>

<bundles_post_ra>
// kernel: tpu_custom_call.1
= control target key start
LH: loop header
LB: loop body
LE: loop exit
PB: predicated region body
PF: predicated region fallthrough
CT: control target
= control target key end

     0   :  { %12 = vsyncpa [#allocation3], 0  ;;  %s3584_s0 = inlined_call_operand.hbm [shape: f32[32,128], index: 0, kind: input, shape index: {}]   ;;  %s3585_s1 = inlined_call_operand.hbm [shape: f32[128,512], index: 1, kind: input, shape index: {}]   ;;  %s3586_s2 = inlined_call_operand.vmem [shape: f32[1,512], index: 2, kind: input, shape index: {}]   ;;  %s3587_s3 = inlined_call_operand.hbm [shape: f32[9,512], index: 3, kind: input, shape index: {}]   ;;  %s3588_s4 = inlined_call_operand.vmem [shape: f32[1,512], index: 4, kind: input, shape index: {}]   ;;  %s3589_s5 = inlined_call_operand.hbm [shape: f32[512,128], index: 5, kind: input, shape index: {}]   ;;  %s3590_s6 = inlined_call_operand.vmem [shape: f32[1,128], index: 6, kind: input, shape index: {}]   ;;  %s3591_s7 = inlined_call_operand.hbm [shape: f32[32,128], index: 7, kind: output, shape index: {}]  }
   0x1   :  { %13 = vsyncpa [#allocation6], 0 }
   0x2   :  { %14 = vsyncpa [#allocation9], 0 }
   0x3   :  { %15 = vsyncpa [#allocation4], 0  ;;  %s1955_s24 = smov [#allocation5]   ;;  %s1837_s28 = scalar_lea.hbm %s3585_s1, 8192 }
   0x4   :  { %s33_s25 = sshll.u32 %s1955_s24, 4  ;;  %p1838_p0 = scmp.ne.s32.totalorder %s3585_s1, %s1837_s28  ;;  %s34_s25 = int_to_ptr.vmem [resolvable:$true] %s33_s25 }
   0x5   :  { %p1841_p1 = scmp.lt.u32.totalorder %s1837_s28, %s3585_s1 }
   0x7   :  { %p1843_p2 = pnand %p1841_p1, %p1838_p0 }
   0x9   :  { %1846 = shalt.err (!%p1843_p2)
}
   0xa   :  { %s1847_s10 = scalar_lea.vmem %s34_s25, 8192  ;;  %p1852_p4 = scmp.lt.s32.totalorder %s34_s25, %s34_s25 }
   0xb   :  { %p1848_p3 = scmp.ne.s32.totalorder %s34_s25, %s1847_s10  ;;  %p1853_p5 = scmp.lt.s32.totalorder %s1847_s10, %s1847_s10 }
   0xd   :  { %p1854_p6 = por %p1853_p5, %p1852_p4 }
   0xf   :  { %p1855_p7 = pnand %p1854_p6, %p1848_p3 }
  0x11   :  { %1858 = shalt.err (!%p1855_p7)
}
  0x12   :  { %s1956_s11 = smov 512   ;;  %s1957_s12 = smov 32  }
  0x13   :  { %39 = dma.hbm_to_vmem [thread:$0]  %s3585_s1, 8192, %s34_s25, [#allocation6], %s1956_s11, %s1956_s11, %s1957_s12  }
  0x14   :  { %s1958_s15 = smov [#allocation2]   ;;  %s1859_s19 = scalar_lea.hbm %s3584_s0, 512 }
  0x15   :  { %s21_s16 = sshll.u32 %s1958_s15, 4  ;;  %p1860_p8 = scmp.ne.s32.totalorder %s3584_s0, %s1859_s19  ;;  %s22_s16 = int_to_ptr.vmem [resolvable:$true] %s21_s16 }
  0x16   :  { %p1863_p9 = scmp.lt.u32.totalorder %s1859_s19, %s3584_s0 }
  0x18   :  { %p1865_p10 = pnand %p1863_p9, %p1860_p8 }
  0x1a   :  { %1868 = shalt.err (!%p1865_p10)
}
  0x1b   :  { %s1869_s24 = scalar_lea.vmem %s22_s16, 512  ;;  %p1874_p12 = scmp.lt.s32.totalorder %s22_s16, %s22_s16 }
  0x1c   :  { %p1870_p11 = scmp.ne.s32.totalorder %s22_s16, %s1869_s24  ;;  %p1875_p13 = scmp.lt.s32.totalorder %s1869_s24, %s1869_s24 }
  0x1e   :  { %p1876_p0 = por %p1875_p13, %p1874_p12 }
  0x20   :  { %p1877_p1 = pnand %p1876_p0, %p1870_p11 }
  0x22   :  { %1880 = shalt.err (!%p1877_p1)
}
  0x23   :  { %s1959_s1 = smov 128   ;;  %s1960_s25 = smov 8  }
  0x24   :  { %27 = dma.hbm_to_vmem [thread:$0]  %s3584_s0, 512, %s22_s16, [#allocation3], %s1959_s1, %s1959_s1, %s1960_s25  }
  0x25   :  { %s1961_s28 = smov [#allocation7]   ;;  %s1962_s30 = smov [#allocation8]  }
  0x26   :  { %s47_s29 = sshll.u32 %s1961_s28, 4  ;;  %s61_s8 = sshll.u32 %s1962_s30, 4  ;;  %s48_s29 = int_to_ptr.vmem [resolvable:$true] %s47_s29  ;;  %s2036_s8 = int_to_ptr.vmem [resolvable:$true] %s61_s8 }
  0x27   :  { %s1881_s13 = scalar_lea.hbm %s3587_s3, 1024 }
  0x28   :  { %p1882_p2 = scmp.ne.s32.totalorder %s3587_s3, %s1881_s13  ;;  %p1885_p3 = scmp.lt.u32.totalorder %s1881_s13, %s3587_s3 }
  0x2a   :  { %p1887_p4 = pnand %p1885_p3, %p1882_p2 }
  0x2c   :  { %1890 = shalt.err (!%p1887_p4)
}
  0x2d   :  { %s1891_s0 = scalar_lea.vmem %s48_s29, 1024  ;;  %p1896_p6 = scmp.lt.s32.totalorder %s48_s29, %s48_s29 }
  0x2e   :  { %p1892_p5 = scmp.ne.s32.totalorder %s48_s29, %s1891_s0  ;;  %p1897_p7 = scmp.lt.s32.totalorder %s1891_s0, %s1891_s0 }
  0x30   :  { %p1898_p8 = por %p1897_p7, %p1896_p6 }
  0x32   :  { %p1899_p9 = pnand %p1898_p8, %p1892_p5 }
  0x34   :  { %1902 = shalt.err (!%p1899_p9)
}
  0x35   :  { %53 = dma.hbm_to_vmem [thread:$0]  %s3587_s3, 1024, %s48_s29, [#allocation6], %s1956_s11, %s1956_s11, %s1957_s12  }
  0x36   :  { %s1903_s22 = scalar_lea.hbm %s3589_s5, 8192 }
  0x37   :  { %p1904_p10 = scmp.ne.s32.totalorder %s3589_s5, %s1903_s22  ;;  %p1907_p11 = scmp.lt.u32.totalorder %s1903_s22, %s3589_s5 }
  0x39   :  { %p1909_p12 = pnand %p1907_p11, %p1904_p10 }
  0x3b   :  { %1912 = shalt.err (!%p1909_p12)
}
  0x3c   :  { %s1913_s28 = scalar_lea.vmem %s2036_s8, 8192  ;;  %p1918_p0 = scmp.lt.s32.totalorder %s2036_s8, %s2036_s8 }
  0x3d   :  { %p1914_p13 = scmp.ne.s32.totalorder %s2036_s8, %s1913_s28  ;;  %p1919_p1 = scmp.lt.s32.totalorder %s1913_s28, %s1913_s28 }
  0x3f   :  { %p1920_p2 = por %p1919_p1, %p1918_p0 }
  0x41   :  { %p1921_p3 = pnand %p1920_p2, %p1914_p13 }
  0x43   :  { %1924 = shalt.err (!%p1921_p3)
}
  0x44   :  { %67 = dma.hbm_to_vmem [thread:$0]  %s3589_s5, 8192, %s2036_s8, [#allocation9], %s1959_s1, %s1959_s1, %s1960_s25  }
  0x45   :  { %1947 = dma.done.wait [#allocation3], 512  }
  0x46   :  { %1948 = vsyncadd [#allocation3], 4294966784 }
  0x47   :  { %1949 = dma.done.wait [#allocation6], 9216  }
  0x48   :  { %1950 = vsyncadd [#allocation6], 4294958080 }
  0x49   :  { %1951 = dma.done.wait [#allocation9], 8192  }
  0x4a   :  { %1952 = vsyncadd [#allocation9], 4294959104  ;;  %v1963_v0 = vmov 0.0   ;;  %v87_v1 = vld [vmem:[#allocation5 + $0x8] sm:$0xff]  ;;  %v89_v3 = vld [vmem:[#allocation5 + $0x18] sm:$0xff] }
  0x4b   :  { %236 = vmatprep.mubr.f32.mxu0 %v1963_v0  ;;  %325 = vmatprep.mubr.f32.mxu1 %v1963_v0  ;;  %v91_v2 = vld [vmem:[#allocation5 + $0x28] sm:$0xff]  ;;  %v93_v5 = vld [vmem:[#allocation5 + $0x38] sm:$0xff]  ;;  %v86_v6 = vld [vmem:[#allocation5] sm:$0xff] }
  0x4c   :  { %v1694_v4 = vpack.c.bf16 %v91_v2, %v87_v1  ;;  %v90_v7 = vld [vmem:[#allocation5 + $0x20] sm:$0xff]  ;;  %v1726_v8 = vpack.c.bf16 %v93_v5, %v89_v3  ;;  %v88_v10 = vld [vmem:[#allocation5 + $0x10] sm:$0xff]  ;;  %v95_v12 = vld [vmem:[#allocation5 + $0x48] sm:$0xff] }
  0x4d   :  { %v1696_v9 = vpack.c.bf16 %v90_v7, %v86_v6  ;;  %v92_v11 = vld [vmem:[#allocation5 + $0x30] sm:$0xff]  ;;  %v99_v14 = vld [vmem:[#allocation5 + $0x68] sm:$0xff]  ;;  %v97_v15 = vld [vmem:[#allocation5 + $0x58] sm:$0xff] }
  0x4e   :  { %1695 = vmatprep.subr.bf16.mxu0 %v1694_v4  ;;  %v1728_v13 = vpack.c.bf16 %v92_v11, %v88_v10  ;;  %v101_v16 = vld [vmem:[#allocation5 + $0x78] sm:$0xff]  ;;  %1727 = vmatprep.subr.bf16.mxu1 %v1726_v8  ;;  %v1698_v17 = vpack.c.bf16 %v99_v14, %v95_v12  ;;  %v94_v19 = vld [vmem:[#allocation5 + $0x40] sm:$0xff]  ;;  %v96_v21 = vld [vmem:[#allocation5 + $0x50] sm:$0xff] }
  0x4f   :  { %1697 = vmatpush1.bf16.msra.mxu0 %v1696_v9  ;;  %v1730_v18 = vpack.c.bf16 %v101_v16, %v97_v15  ;;  %v98_v20 = vld [vmem:[#allocation5 + $0x60] sm:$0xff]  ;;  %v100_v23 = vld [vmem:[#allocation5 + $0x70] sm:$0xff]  ;;  %v103_v24 = vld [vmem:[#allocation5 + $0x88] sm:$0xff] }
  0x50   :  { %1729 = vmatpush1.bf16.msra.mxu1 %v1728_v13  ;;  %v1700_v22 = vpack.c.bf16 %v98_v20, %v94_v19  ;;  %v107_v25 = vld [vmem:[#allocation5 + $0xa8] sm:$0xff]  ;;  %1699 = vmatprep.subr.bf16.mxu0 %v1698_v17  ;;  %v1732_v26 = vpack.c.bf16 %v100_v23, %v96_v21  ;;  %v105_v28 = vld [vmem:[#allocation5 + $0x98] sm:$0xff]  ;;  %v102_v30 = vld [vmem:[#allocation5 + $0x80] sm:$0xff] }
  0x51   :  { %1731 = vmatprep.subr.bf16.mxu1 %v1730_v18  ;;  %v1702_v27 = vpack.c.bf16 %v107_v25, %v103_v24  ;;  %v109_v29 = vld [vmem:[#allocation5 + $0xb8] sm:$0xff]  ;;  %v106_v32 = vld [vmem:[#allocation5 + $0xa0] sm:$0xff]  ;;  %v104_v33 = vld [vmem:[#allocation5 + $0x90] sm:$0xff] }
  0x52   :  { %v1734_v31 = vpack.c.bf16 %v109_v29, %v105_v28  ;;  %v108_v34 = vld [vmem:[#allocation5 + $0xb0] sm:$0xff]  ;;  %v1704_v35 = vpack.c.bf16 %v106_v32, %v102_v30  ;;  %v111_v36 = vld [vmem:[#allocation5 + $0xc8] sm:$0xff]  ;;  %v113_v38 = vld [vmem:[#allocation5 + $0xd8] sm:$0xff] }
  0x53   :  { %1701 = vmatpush1.bf16.msra.mxu0 %v1700_v22  ;;  %v115_v37 = vld [vmem:[#allocation5 + $0xe8] sm:$0xff]  ;;  %v1736_v39 = vpack.c.bf16 %v108_v34, %v104_v33  ;;  %v117_v41 = vld [vmem:[#allocation5 + $0xf8] sm:$0xff]  ;;  %v110_v42 = vld [vmem:[#allocation5 + $0xc0] sm:$0xff] }
  0x54   :  { %1733 = vmatpush1.bf16.msra.mxu1 %v1732_v26  ;;  %1703 = vmatprep.subr.bf16.mxu0 %v1702_v27  ;;  %v1706_v40 = vpack.c.bf16 %v115_v37, %v111_v36  ;;  %v114_v43 = vld [vmem:[#allocation5 + $0xe0] sm:$0xff]  ;;  %v1738_v44 = vpack.c.bf16 %v117_v41, %v113_v38  ;;  %v112_v45 = vld [vmem:[#allocation5 + $0xd0] sm:$0xff]  ;;  %v119_v47 = vld [vmem:[#allocation5 + $0x108] sm:$0xff]  ;;  %v152_v38 = vlaneseq }
  0x55   :  { %1735 = vmatprep.subr.bf16.mxu1 %v1734_v31  ;;  %v116_v46 = vld [vmem:[#allocation5 + $0xf0] sm:$0xff]  ;;  %v123_v48 = vld [vmem:[#allocation5 + $0x128] sm:$0xff]  ;;  %v121_v49 = vld [vmem:[#allocation5 + $0x118] sm:$0xff]  ;;  %v1708_v51 = vpack.c.bf16 %v114_v43, %v110_v42 }
  0x56   :  { %v125_v50 = vld [vmem:[#allocation5 + $0x138] sm:$0xff]  ;;  %v1740_v52 = vpack.c.bf16 %v116_v46, %v112_v45  ;;  %v1710_v53 = vpack.c.bf16 %v123_v48, %v119_v47  ;;  %v118_v54 = vld [vmem:[#allocation5 + $0x100] sm:$0xff]  ;;  %v120_v56 = vld [vmem:[#allocation5 + $0x110] sm:$0xff] }
  0x57   :  { %1705 = vmatpush1.bf16.msra.mxu0 %v1704_v35  ;;  %v122_v55 = vld [vmem:[#allocation5 + $0x120] sm:$0xff]  ;;  %v1742_v57 = vpack.c.bf16 %v125_v50, %v121_v49  ;;  %v124_v58 = vld [vmem:[#allocation5 + $0x130] sm:$0xff]  ;;  %v127_v59 = vld [vmem:[#allocation5 + $0x148] sm:$0xff] }
  0x58   :  { %1737 = vmatpush1.bf16.msra.mxu1 %v1736_v39  ;;  %1707 = vmatprep.subr.bf16.mxu0 %v1706_v40  ;;  %v131_v60 = vld [vmem:[#allocation5 + $0x168] sm:$0xff]  ;;  %v129_v61 = vld [vmem:[#allocation5 + $0x158] sm:$0xff]  ;;  %v1712_v63 = vpack.c.bf16 %v122_v55, %v118_v54  ;;  %v1744_v1 = vpack.c.bf16 %v124_v58, %v120_v56  ;;  %v126_v3 = vld [vmem:[#allocation5 + $0x140] sm:$0xff]  ;;  %v2082_v39 = vshrl.u32 %v152_v38, 7 }
  0x59   :  { %1739 = vmatprep.subr.bf16.mxu1 %v1738_v44  ;;  %v133_v62 = vld [vmem:[#allocation5 + $0x178] sm:$0xff]  ;;  %v1714_v2 = vpack.c.bf16 %v131_v60, %v127_v59  ;;  %v130_v4 = vld [vmem:[#allocation5 + $0x160] sm:$0xff]  ;;  %v128_v5 = vld [vmem:[#allocation5 + $0x150] sm:$0xff] }
  0x5a   :  { %v1746_v6 = vpack.c.bf16 %v133_v62, %v129_v61  ;;  %v132_v7 = vld [vmem:[#allocation5 + $0x170] sm:$0xff]  ;;  %v135_v8 = vld [vmem:[#allocation5 + $0x188] sm:$0xff]  ;;  %v137_v10 = vld [vmem:[#allocation5 + $0x198] sm:$0xff]  ;;  %v1716_v12 = vpack.c.bf16 %v130_v4, %v126_v3  ;;  %v2085_v40 = vsub.s32 0, %v2082_v39  ;;  %v2091_v42 = vsub.s32 2, %v2082_v39 }
  0x5b   :  { %1709 = vmatpush1.bf16.msra.mxu0 %v1708_v51  ;;  %v139_v9 = vld [vmem:[#allocation5 + $0x1a8] sm:$0xff]  ;;  %v141_v11 = vld [vmem:[#allocation5 + $0x1b8] sm:$0xff]  ;;  %v1748_v13 = vpack.c.bf16 %v132_v7, %v128_v5  ;;  %v134_v15 = vld [vmem:[#allocation5 + $0x180] sm:$0xff]  ;;  %v2094_v43 = vsub.s32 1, %v2082_v39  ;;  %vm391_vm0 = vcmp.lt.s32.totalorder %v2082_v39, 1  ;;  %vm977_vm1 = vcmp.lt.s32.totalorder %v2082_v39, 7 }
  0x5c   :  { %1741 = vmatpush1.bf16.msra.mxu1 %v1740_v52  ;;  %1711 = vmatprep.subr.bf16.mxu0 %v1710_v53  ;;  %v1718_v14 = vpack.c.bf16 %v139_v9, %v135_v8  ;;  %v138_v16 = vld [vmem:[#allocation5 + $0x1a0] sm:$0xff]  ;;  %v136_v17 = vld [vmem:[#allocation5 + $0x190] sm:$0xff]  ;;  %v1750_v18 = vpack.c.bf16 %v141_v11, %v137_v10  ;;  %v143_v20 = vld [vmem:[#allocation5 + $0x1c8] sm:$0xff]  ;;  %3695 = vst [vmem:[#allocation15_spill] sm:$0xff] %v2085_v40 }
  0x5d   :  { %1743 = vmatprep.subr.bf16.mxu1 %v1742_v57  ;;  %v140_v19 = vld [vmem:[#allocation5 + $0x1b0] sm:$0xff]  ;;  %v147_v21 = vld [vmem:[#allocation5 + $0x1e8] sm:$0xff]  ;;  %v145_v22 = vld [vmem:[#allocation5 + $0x1d8] sm:$0xff]  ;;  %v1720_v24 = vpack.c.bf16 %v138_v16, %v134_v15  ;;  %3696 = vst [vmem:[#allocation16_spill] sm:$0xff] %v2091_v42 }
  0x5e   :  { %v149_v23 = vld [vmem:[#allocation5 + $0x1f8] sm:$0xff]  ;;  %v1752_v25 = vpack.c.bf16 %v140_v19, %v136_v17  ;;  %v1722_v26 = vpack.c.bf16 %v147_v21, %v143_v20  ;;  %v142_v27 = vld [vmem:[#allocation5 + $0x1c0] sm:$0xff]  ;;  %v144_v30 = vld [vmem:[#allocation5 + $0x1d0] sm:$0xff]  ;;  %3697 = vst [vmem:[#allocation17_spill] sm:$0xff] %v2094_v43 }
  0x5f   :  { %1713 = vmatpush1.bf16.msra.mxu0 %v1712_v63  ;;  %v146_v28 = vld [vmem:[#allocation5 + $0x1e0] sm:$0xff]  ;;  %v1754_v29 = vpack.c.bf16 %v149_v23, %v145_v22  ;;  %v148_v31 = vld [vmem:[#allocation5 + $0x1f0] sm:$0xff]  ;;  %v83_v35 = vld [vmem:[#allocation2 + $0x8] sm:$0xff] }
  0x60   :  { %1745 = vmatpush1.bf16.msra.mxu1 %v1744_v1  ;;  %1715 = vmatprep.subr.bf16.mxu0 %v1714_v2  ;;  %v1724_v32 = vpack.c.bf16 %v146_v28, %v142_v27  ;;  %v1756_v33 = vpack.c.bf16 %v148_v31, %v144_v30  ;;  %v82_v34 = vld [vmem:[#allocation2] sm:$0xff]  ;;  %v84_v36 = vld [vmem:[#allocation2 + $0x10] sm:$0xff]  ;;  %v85_v37 = vld [vmem:[#allocation2 + $0x18] sm:$0xff] }
  0x61   :  { %1747 = vmatprep.subr.bf16.mxu1 %v1746_v6  ;;  %v150_v41 = vld [vmem:[%s3586_s2] sm:$0xf]  ;;  %s1964_s2 = smov 96  }
  0x62   :  { %v155_v44 = vrot.slane %v150_v41, %v2085_v40  ;;  %v163_v45 = vrot.slane %v150_v41, %v2091_v42  ;;  %v159_v46 = vrot.slane %v150_v41, %v2094_v43 }
  0x63   :  { %1717 = vmatpush1.bf16.msra.mxu0 %v1716_v12 }
  0x64   :  { %1749 = vmatpush1.bf16.msra.mxu1 %v1748_v13  ;;  %1719 = vmatprep.subr.bf16.mxu0 %v1718_v14 }
  0x65   :  { %1751 = vmatprep.subr.bf16.mxu1 %v1750_v18 }
  0x67   :  { %1721 = vmatpush1.bf16.msra.mxu0 %v1720_v24 }
  0x68   :  { %1753 = vmatpush1.bf16.msra.mxu1 %v1752_v25  ;;  %1723 = vmatprep.subr.bf16.mxu0 %v1722_v26 }
  0x69   :  { %1755 = vmatprep.subr.bf16.mxu1 %v1754_v29 }
  0x6b   :  { %1725 = vmatpush1.bf16.msra.mxu0 %v1724_v32 }
  0x6c   :  { %1757 = vmatpush1.bf16.msra.mxu1 %v1756_v33 }
  0x6e   :  { %237 = vmatmul.mubr.f32.vlgmr.msra.gmra.mrb[0].mxu0 %v82_v34 }
  0x6f   :  { %326 = vmatmul.mubr.f32.vlgmr.msra.gmra.mrb[0].mxu1 %v82_v34  ;;  %242 = vmatprep.mubr.f32.mxu0 %v1963_v0 }
  0x70   :  { %331 = vmatprep.mubr.f32.mxu1 %v1963_v0 }
  0x72   :  { %243 = vmatmul.mubr.f32.gmra.mrb[2].mxu0 %v83_v35 }
  0x73   :  { %332 = vmatmul.mubr.f32.gmra.mrb[2].mxu1 %v83_v35  ;;  %248 = vmatprep.mubr.f32.mxu0 %v1963_v0 }
  0x74   :  { %337 = vmatprep.mubr.f32.mxu1 %v1963_v0 }
  0x76   :  { %249 = vmatmul.mubr.f32.gmra.mrb[4].mxu0 %v84_v36 }
  0x77   :  { %338 = vmatmul.mubr.f32.gmra.mrb[4].mxu1 %v84_v36  ;;  %254 = vmatprep.mubr.f32.mxu0 %v1963_v0 }
  0x78   :  { %343 = vmatprep.mubr.f32.mxu1 %v1963_v0  ;;  %v2097_v0 = vsub.s32 3, %v2082_v39 }
  0x7a   :  { %255 = vmatmul.mubr.f32.gmra.mrb[6].mxu0 %v85_v37  ;;  %3698 = vst [vmem:[#allocation18_spill] sm:$0xff] %v2097_v0  ;;  %v2103_v47 = vrot.slane %v150_v41, %v2097_v0 }
  0x7b   :  { %344 = vmatmul.mubr.f32.gmra.mrb[6].mxu1 %v85_v37 }
 0x141   :  { %v238_v48 = vpop.f32.mrb[0].mxu0 }
 0x142   :  { %v239_v49 = vadd.f32 %v238_v48, %v155_v44  ;;  %v327_v50 = vpop.f32.mrb[0].mxu1  ;;  %v240_v51 = vpop.f32.mrb[1].mxu0 }
 0x143   :  { %v328_v52 = vadd.f32 %v327_v50, %v163_v45  ;;  %v329_v53 = vpop.f32.mrb[1].mxu1  ;;  %v241_v55 = vadd.f32 %v240_v51, %v159_v46 }
 0x144   :  { %v2105_v54 = vmax.f32 %v239_v49, 0.0  ;;  %v330_v56 = vadd.f32 %v329_v53, %v2103_v47 }
 0x145   :  { %v2108_v57 = vmax.f32 %v328_v52, 0.0  ;;  %v244_v58 = vpop.f32.mrb[2].mxu0  ;;  %v2116_v2 = vmax.f32 %v241_v55, 0.0 }
 0x146   :  { %3699 = vst [vmem:[#allocation19_spill] sm:$0xff] %v2105_v54  ;;  %v245_v59 = vadd.f32 %v244_v58, %v155_v44  ;;  %v333_v60 = vpop.f32.mrb[2].mxu1  ;;  %v246_v61 = vpop.f32.mrb[3].mxu0  ;;  %700 = vrot.lane.b32.xlu0 %v2105_v54, %s1957_s12  ;;  %v2118_v3 = vmax.f32 %v330_v56, 0.0  ;;  %v375_v9 = vrot.slane %v2105_v54, 7  ;;  %v961_v10 = vrot.slane %v2105_v54, 1 }
 0x147   :  { %3700 = vst [vmem:[#allocation20_spill] sm:$0xff] %v2108_v57  ;;  %v334_v62 = vadd.f32 %v333_v60, %v163_v45  ;;  %v335_v63 = vpop.f32.mrb[3].mxu1  ;;  %716 = vrot.lane.b32.xlu1 %v2108_v57, %s1957_s12  ;;  %v247_v1 = vadd.f32 %v246_v61, %v159_v46  ;;  %3701 = vst [vmem:[#allocation21_spill] sm:$0xff] %v2116_v2  ;;  %v377_v8 = vrot.slane %v2108_v57, 7  ;;  %v963_v28 = vrot.slane %v2108_v57, 1 }
 0x148   :  { %3702 = vst [vmem:[#allocation22_spill] sm:$0xff] %v2118_v3  ;;  %v2120_v4 = vmax.f32 %v245_v59, 0.0  ;;  %v336_v5 = vadd.f32 %v335_v63, %v2103_v47  ;;  %v376_v33 = vrot.slane %v2116_v2, 7  ;;  %v378_v34 = vrot.slane %v2118_v3, 7 }
 0x149   :  { %v2123_v6 = vmax.f32 %v334_v62, 0.0  ;;  %v250_v7 = vpop.f32.mrb[4].mxu0  ;;  %v2128_v11 = vmax.f32 %v247_v1, 0.0  ;;  %v962_v51 = vrot.slane %v2116_v2, 1  ;;  %v964_v53 = vrot.slane %v2118_v3, 1 }
 0x14a   :  { %858 = vrot.lane.b32.xlu0 %v2105_v54, %s1964_s2  ;;  %v251_v12 = vadd.f32 %v250_v7, %v155_v44  ;;  %v339_v13 = vpop.f32.mrb[4].mxu1  ;;  %v252_v14 = vpop.f32.mrb[5].mxu0  ;;  %v379_v15 = vrot.slane %v2120_v4, 7  ;;  %v965_v16 = vrot.slane %v2120_v4, 1  ;;  %v2134_v17 = vmax.f32 %v336_v5, 0.0 }
 0x14b   :  { %874 = vrot.lane.b32.xlu1 %v2108_v57, %s1964_s2  ;;  %v340_v18 = vadd.f32 %v339_v13, %v163_v45  ;;  %v341_v19 = vpop.f32.mrb[5].mxu1  ;;  %v381_v20 = vrot.slane %v2123_v6, 7  ;;  %v967_v21 = vrot.slane %v2123_v6, 1  ;;  %v253_v22 = vadd.f32 %v252_v14, %v159_v46 }
 0x14c   :  { %v342_v23 = vadd.f32 %v341_v19, %v2103_v47  ;;  %v2145_v24 = vsel %vm391_vm0, %v375_v9, %v379_v15  ;;  %v2151_v25 = vsel %vm977_vm1, %v961_v10, %v965_v16  ;;  %v2160_v29 = vmax.f32 %v251_v12, 0.0 }
 0x14d   :  { %3703 = vst [vmem:[#allocation23_spill] sm:$0xff] %v2151_v25  ;;  %v256_v26 = vpop.f32.mrb[6].mxu0  ;;  %v2157_v27 = vsel %vm391_vm0, %v377_v8, %v381_v20  ;;  %v2172_v41 = vsel %vm977_vm1, %v963_v28, %v967_v21  ;;  %v2175_v48 = vmax.f32 %v340_v18, 0.0  ;;  %v2177_v49 = vmax.f32 %v253_v22, 0.0 }
 0x14e   :  { %3704 = vst [vmem:[#allocation24_spill] sm:$0xff] %v2160_v29  ;;  %v257_v30 = vadd.f32 %v256_v26, %v155_v44  ;;  %v345_v31 = vpop.f32.mrb[6].mxu1  ;;  %v258_v32 = vpop.f32.mrb[7].mxu0  ;;  %866 = vrot.lane.b32.xlu0 %v2116_v2, %s1964_s2  ;;  %3705 = vst [vmem:[#allocation25_spill] sm:$0xff] %v2172_v41  ;;  %v380_v44 = vrot.slane %v2128_v11, 7  ;;  %v966_v52 = vrot.slane %v2128_v11, 1 }
 0x14f   :  { %v346_v35 = vadd.f32 %v345_v31, %v163_v45  ;;  %v259_v36 = vadd.f32 %v258_v32, %v159_v46  ;;  %v347_v37 = vpop.f32.mrb[7].mxu1  ;;  %708 = vrot.lane.b32.xlu1 %v2116_v2, %s1957_s12  ;;  %3706 = vst [vmem:[#allocation26_spill] sm:$0xff] %v2175_v48  ;;  %3707 = vst [vmem:[#allocation27_spill] sm:$0xff] %v2177_v49  ;;  %v382_v45 = vrot.slane %v2134_v17, 7  ;;  %v968_v55 = vrot.slane %v2134_v17, 1 }
 0x150   :  { %v348_v50 = vadd.f32 %v347_v37, %v2103_v47  ;;  %v2185_v46 = vsel %vm391_vm0, %v376_v33, %v380_v44  ;;  %v2203_v56 = vsel %vm977_vm1, %v962_v51, %v966_v52  ;;  %v383_v58 = vrot.slane %v2160_v29, 7 }
 0x151   :  { %v2195_v47 = vsel %vm391_vm0, %v378_v34, %v382_v45  ;;  %3708 = vst [vmem:[#allocation28_spill] sm:$0xff] %v2203_v56  ;;  %v969_v59 = vrot.slane %v2160_v29, 1  ;;  %v2207_v60 = vmax.f32 %v342_v23, 0.0  ;;  %v2211_v61 = vsel %vm977_vm1, %v964_v53, %v968_v55 }
 0x152   :  { %702 = vrot.lane.b32.xlu0 %v2120_v4, %s1957_s12  ;;  %3710 = vst [vmem:[#allocation30_spill] sm:$0xff] %v2211_v61  ;;  %v971_v62 = vrot.slane %v2175_v48, 1  ;;  %v384_v63 = vrot.slane %v2177_v49, 7  ;;  %v2215_v1 = vmax.f32 %v257_v30, 0.0  ;;  %v2219_v5 = vsel %vm391_vm0, %v379_v15, %v383_v58 }
 0x153   :  { %724 = vrot.lane.b32.xlu1 %v2118_v3, %s1957_s12  ;;  %3709 = vst [vmem:[#allocation29_spill] sm:$0xff] %v2207_v60  ;;  %v2223_v7 = vsel %vm977_vm1, %v965_v16, %v969_v59  ;;  %v385_v12 = vrot.slane %v2175_v48, 7  ;;  %v2236_v18 = vmax.f32 %v346_v35, 0.0  ;;  %v3594_v16 = vrot.slane %v2207_v60, 7 }
 0x154   :  { %3711 = vst [vmem:[#allocation31_spill] sm:$0xff] %v2215_v1  ;;  %v2230_v13 = vsel %vm977_vm1, %v967_v21, %v971_v62  ;;  %v2234_v14 = vsel %vm391_vm0, %v380_v44, %v384_v63  ;;  %v970_v19 = vrot.slane %v2177_v49, 1  ;;  %v3592_v21 = vrot.slane %v2207_v60, 1 }
 0x155   :  { %3712 = vst [vmem:[#allocation32_spill] sm:$0xff] %v2236_v18  ;;  %v2242_v15 = vsel %vm391_vm0, %v381_v20, %v385_v12  ;;  %v387_v22 = vrot.slane %v2215_v1, 7  ;;  %v2254_v23 = vsel %vm391_vm0, %v382_v45, %v3594_v16  ;;  %v973_v20 = vrot.slane %v2215_v1, 1 }
 0x156   :  { %718 = vrot.lane.b32.xlu0 %v2123_v6, %s1957_s12  ;;  %v2261_v26 = vsel %vm977_vm1, %v966_v52, %v970_v19  ;;  %v2267_v30 = vsel %vm977_vm1, %v968_v55, %v3592_v21  ;;  %v389_v32 = vrot.slane %v2236_v18, 7  ;;  %v2274_v35 = vmax.f32 %v259_v36, 0.0 }
 0x157   :  { %882 = vrot.lane.b32.xlu1 %v2118_v3, %s1964_s2  ;;  %v2271_v31 = vsel %vm391_vm0, %v383_v58, %v387_v22  ;;  %v2276_v37 = vmax.f32 %v348_v50, 0.0  ;;  %v2280_v44 = vsel %vm977_vm1, %v969_v59, %v973_v20  ;;  %v975_v52 = vrot.slane %v2236_v18, 1 }
 0x158   :  { %3713 = vst [vmem:[#allocation33_spill] sm:$0xff] %v2271_v31  ;;  %3714 = vst [vmem:[#allocation34_spill] sm:$0xff] %v2274_v35  ;;  %v2284_v45 = vsel %vm391_vm0, %v385_v12, %v389_v32  ;;  %v2295_v36 = vsel %vm391_vm0, %v387_v22, %v375_v9  ;;  %v2301_v50 = vsel %vm391_vm0, %v389_v32, %v377_v8  ;;  %v388_v58 = vrot.slane %v2274_v35, 7 }
 0x159   :  { %3715 = vst [vmem:[#allocation35_spill] sm:$0xff] %v2276_v37  ;;  %3716 = vst [vmem:[#allocation36_spill] sm:$0xff] %v2284_v45  ;;  %v3595_v55 = vrot.slane %v2276_v37, 7  ;;  %v2307_v59 = vsel %vm977_vm1, %v971_v62, %v975_v52  ;;  %v3593_v8 = vrot.slane %v2276_v37, 1  ;;  %v974_v12 = vrot.slane %v2274_v35, 1 }
 0x15a   :  { %876 = vrot.lane.b32.xlu0 %v2123_v6, %s1964_s2  ;;  %3717 = vst [vmem:[#allocation37_spill] sm:$0xff] %v2307_v59  ;;  %v2313_v9 = vsel %vm391_vm0, %v384_v63, %v388_v58  ;;  %v2323_v62 = vsel %vm391_vm0, %v388_v58, %v376_v33  ;;  %v2337_v22 = vsel %vm977_vm1, %v973_v20, %v961_v10  ;;  %v3746_v54 = vrot.slane %v2207_v60, 7 }
 0x15b   :  { %710 = vrot.lane.b32.xlu1 %v2128_v11, %s1957_s12  ;;  %3718 = vst [vmem:[#allocation38_spill] sm:$0xff] %v2313_v9  ;;  %v2331_v63 = vsel %vm391_vm0, %v3595_v55, %v378_v34  ;;  %v2343_v33 = vsel %vm977_vm1, %v975_v52, %v963_v28  ;;  %v2347_v32 = vsel %vm977_vm1, %v970_v19, %v974_v12  ;;  %v369_v34 = vadd.s32 16, %v2082_v39 }
 0x15c   :  { %v2357_v10 = vsel %vm977_vm1, %v3593_v8, %v964_v53  ;;  %v2361_v28 = vsel %vm977_vm1, %v974_v12, %v962_v51  ;;  %v368_v53 = vadd.s32 8, %v2082_v39 }
 0x15d   :  { %3719 = vst [vmem:[#allocation39_spill] sm:$0xff] %v2357_v10  ;;  %3720 = vst [vmem:[#allocation40_spill] sm:$0xff] %v2361_v28  ;;  %v373_v51 = vand.u32 15, %v369_v34  ;;  %v1343_v10 = vld [vmem:[#allocation8 + $0x30] sm:$0xff] }
 0x15e   :  { %860 = vrot.lane.b32.xlu0 %v2120_v4, %s1964_s2  ;;  %v372_v20 = vand.u32 15, %v368_v53 }
 0x15f   :  { %726 = vrot.lane.b32.xlu1 %v2134_v17, %s1957_s12  ;;  %vm2399_vm2 = vcmp.ge.s32.totalorder %v373_v51, 1  ;;  %v2489_v51 = vand.u32 127, %v152_v38 }
 0x160   :  { %v2408_v52 = vsel %vm2399_vm2, %v2219_v5, 0.0  ;;  %vm2412_vm3 = vcmp.lt.s32.totalorder %v372_v20, 15  ;;  %v2461_v34 = vsel %vm2399_vm2, %v2254_v23, 0.0 }
 0x161   :  { %3723 = vst [vmem:[#allocation41_spill] sm:$0xff] %v2408_v52  ;;  %v2421_v12 = vsel %vm2412_vm3, %v2223_v7, 0.0  ;;  %v2434_v5 = vsel %vm2412_vm3, %v2230_v13, 0.0  ;;  %v2447_v7 = vsel %vm2399_vm2, %v2234_v14, 0.0  ;;  %v2454_v13 = vsel %vm2399_vm2, %v2242_v15, 0.0  ;;  %3730 = vst [vmem:[#allocation46_spill] sm:$0xff] %v2461_v34 }
 0x162   :  { %454 = vrot.lane.b32.xlu0 %v2157_v27, %s1957_s12  ;;  %3726 = vst [vmem:[#allocation42_spill] sm:$0xff] %v2421_v12  ;;  %3727 = vst [vmem:[#allocation43_spill] sm:$0xff] %v2434_v5  ;;  %v2482_v14 = vsel %vm2412_vm3, %v2261_v26, 0.0  ;;  %v2496_v53 = vsel %vm2412_vm3, %v2267_v30, 0.0  ;;  %vm628_vm4 = vcmp.lt.s32.totalorder %v2489_v51, 96  ;;  %vm470_vm5 = vcmp.lt.s32.totalorder %v2489_v51, 32 }
 0x163   :  { %868 = vrot.lane.b32.xlu1 %v2128_v11, %s1964_s2  ;;  %3728 = vst [vmem:[#allocation44_spill] sm:$0xff] %v2447_v7  ;;  %3729 = vst [vmem:[#allocation45_spill] sm:$0xff] %v2454_v13 }
 0x164   :  { %3731 = vst [vmem:[#allocation47_spill] sm:$0xff] %v2482_v14  ;;  %3732 = vst [vmem:[#allocation48_spill] sm:$0xff] %v2496_v53 }
 0x166   :  { %614 = vrot.lane.b32.xlu0 %v2157_v27, %s1964_s2 }
 0x167   :  { %884 = vrot.lane.b32.xlu1 %v2134_v17, %s1964_s2 }
 0x16a   :  { %598 = vrot.lane.b32.xlu0 %v2145_v24, %s1964_s2 }
 0x16b   :  { %438 = vrot.lane.b32.xlu1 %v2145_v24, %s1957_s12 }
 0x16e   :  { %1022 = vrot.lane.b32.xlu0 %v2151_v25, %s1957_s12 }
 0x16f   :  { %1038 = vrot.lane.b32.xlu1 %v2172_v41, %s1957_s12 }
 0x172   :  { %1180 = vrot.lane.b32.xlu0 %v2151_v25, %s1964_s2 }
 0x173   :  { %1196 = vrot.lane.b32.xlu1 %v2172_v41, %s1964_s2  ;;  %v1370_v41 = vld [vmem:[#allocation8 + $0x108] sm:$0xff] }
 0x176   :  { %446 = vrot.lane.b32.xlu0 %v2185_v46, %s1957_s12 }
 0x177   :  { %606 = vrot.lane.b32.xlu1 %v2185_v46, %s1964_s2 }
 0x17a   :  { %462 = vrot.lane.b32.xlu0 %v2195_v47, %s1957_s12 }
 0x17b   :  { %622 = vrot.lane.b32.xlu1 %v2195_v47, %s1964_s2 }
 0x17e   :  { %720 = vrot.lane.b32.xlu0 %v2175_v48, %s1957_s12 }
 0x17f   :  { %1030 = vrot.lane.b32.xlu1 %v2203_v56, %s1957_s12 }
 0x182   :  { %1188 = vrot.lane.b32.xlu0 %v2203_v56, %s1964_s2  ;;  %v1369_v56 = vld [vmem:[#allocation8 + $0x100] sm:$0xff] }
 0x183   :  { %1046 = vrot.lane.b32.xlu1 %v2211_v61, %s1957_s12 }
 0x186   :  { %712 = vrot.lane.b32.xlu0 %v2177_v49, %s1957_s12 }
 0x187   :  { %704 = vrot.lane.b32.xlu1 %v2160_v29, %s1957_s12 }
 0x18a   :  { %870 = vrot.lane.b32.xlu0 %v2177_v49, %s1964_s2 }
 0x18b   :  { %878 = vrot.lane.b32.xlu1 %v2175_v48, %s1964_s2  ;;  %v1382_v48 = vld [vmem:[#allocation8 + $0x168] sm:$0xff] }
 0x18e   :  { %600 = vrot.lane.b32.xlu0 %v2408_v52, %s1964_s2 }
 0x18f   :  { %1204 = vrot.lane.b32.xlu1 %v2211_v61, %s1964_s2 }
 0x192   :  { %1024 = vrot.lane.b32.xlu0 %v2421_v12, %s1957_s12 }
 0x193   :  { %862 = vrot.lane.b32.xlu1 %v2160_v29, %s1964_s2 }
 0x196   :  { %706 = vrot.lane.b32.xlu0 %v2215_v1, %s1957_s12 }
 0x197   :  { %728 = vrot.lane.b32.xlu1 %v2207_v60, %s1957_s12 }
 0x19a   :  { %1040 = vrot.lane.b32.xlu0 %v2434_v5, %s1957_s12 }
 0x19b   :  { %886 = vrot.lane.b32.xlu1 %v2207_v60, %s1964_s2 }
 0x19e   :  { %722 = vrot.lane.b32.xlu0 %v2236_v18, %s1957_s12 }
 0x19f   :  { %440 = vrot.lane.b32.xlu1 %v2408_v52, %s1957_s12 }
 0x1a2   :  { %448 = vrot.lane.b32.xlu0 %v2447_v7, %s1957_s12 }
 0x1a3   :  { %456 = vrot.lane.b32.xlu1 %v2454_v13, %s1957_s12 }
 0x1a6   :  { %464 = vrot.lane.b32.xlu0 %v2461_v34, %s1957_s12 }
 0x1a7   :  { %616 = vrot.lane.b32.xlu1 %v2454_v13, %s1964_s2 }
 0x1aa   :  { %608 = vrot.lane.b32.xlu0 %v2447_v7, %s1964_s2 }
 0x1ab   :  { %1198 = vrot.lane.b32.xlu1 %v2434_v5, %s1964_s2  ;;  %v1372_v5 = vld [vmem:[#allocation8 + $0x118] sm:$0xff] }
 0x1ae   :  { %624 = vrot.lane.b32.xlu0 %v2461_v34, %s1964_s2 }
 0x1af   :  { %1182 = vrot.lane.b32.xlu1 %v2421_v12, %s1964_s2  ;;  %v3749_v12 = vrot.slane %v2276_v37, 1 }
 0x1b2   :  { %730 = vrot.lane.b32.xlu0 %v2276_v37, %s1957_s12 }
 0x1b3   :  { %880 = vrot.lane.b32.xlu1 %v2236_v18, %s1964_s2  ;;  %v1338_v18 = vld [vmem:[#allocation8 + $0x8] sm:$0xff] }
 0x1b6   :  { %1190 = vrot.lane.b32.xlu0 %v2482_v14, %s1964_s2 }
 0x1b7   :  { %1032 = vrot.lane.b32.xlu1 %v2482_v14, %s1957_s12  ;;  %v3750_v14 = vrot.slane %v2207_v60, 1 }
 0x1b8   :  { %v701_v15 = vpop.permute.xlu0 %700 }
 0x1b9   :  { %v717_v23 = vpop.permute.xlu1 %716 }
 0x1ba   :  { %872 = vrot.lane.b32.xlu0 %v2274_v35, %s1964_s2 }
 0x1bb   :  { %1048 = vrot.lane.b32.xlu1 %v2496_v53, %s1957_s12 }
 0x1bc   :  { %v859_v26 = vpop.permute.xlu0 %858 }
 0x1bd   :  { %v875_v19 = vpop.permute.xlu1 %874 }
 0x1be   :  { %442 = vrot.lane.b32.xlu0 %v2271_v31, %s1957_s12 }
 0x1bf   :  { %714 = vrot.lane.b32.xlu1 %v2274_v35, %s1957_s12 }
 0x1c0   :  { %v867_v38 = vpop.permute.xlu0 %866 }
 0x1c1   :  { %v709_v20 = vpop.permute.xlu1 %708  ;;  %v2508_v30 = vsel %vm628_vm4, %v867_v38, %v875_v19  ;;  %v2512_v58 = vsel %vm628_vm4, %v859_v26, %v867_v38 }
 0x1c2   :  { %3733 = vst [vmem:[#allocation49_spill] sm:$0xff] %v2508_v30  ;;  %3734 = vst [vmem:[#allocation50_spill] sm:$0xff] %v2512_v58  ;;  %v2516_v21 = vsel %vm470_vm5, %v709_v20, %v717_v23  ;;  %v2520_v8 = vsel %vm470_vm5, %v701_v15, %v709_v20  ;;  %602 = vrot.lane.b32.xlu0 %v2271_v31, %s1964_s2  ;;  %v371_v20 = vand.u32 15, %v2082_v39 }
 0x1c3   :  { %3735 = vst [vmem:[#allocation51_spill] sm:$0xff] %v2516_v21  ;;  %3736 = vst [vmem:[#allocation52_spill] sm:$0xff] %v2520_v8  ;;  %1206 = vrot.lane.b32.xlu1 %v2496_v53, %s1964_s2  ;;  %v1337_v8 = vld [vmem:[#allocation8] sm:$0xff] }
 0x1c4   :  { %v703_v16 = vpop.permute.xlu0 %702  ;;  %vm2549_vm6 = vcmp.ge.s32.totalorder %v371_v20, 1 }
 0x1c5   :  { %v725_v55 = vpop.permute.xlu1 %724  ;;  %v2573_v20 = vsel %vm2549_vm6, %v2301_v50, 0.0  ;;  %v1353_v50 = vld [vmem:[#allocation8 + $0x80] sm:$0xff] }
 0x1c6   :  { %v2528_v38 = vsel %vm470_vm5, %v717_v23, %v725_v55  ;;  %v2532_v35 = vsel %vm470_vm5, %v725_v55, %v701_v15  ;;  %1026 = vrot.lane.b32.xlu0 %v2280_v44, %s1957_s12  ;;  %3744 = vst [vmem:[#allocation58_spill] sm:$0xff] %v2573_v20 }
 0x1c7   :  { %3737 = vst [vmem:[#allocation53_spill] sm:$0xff] %v2528_v38  ;;  %3738 = vst [vmem:[#allocation54_spill] sm:$0xff] %v2532_v35  ;;  %458 = vrot.lane.b32.xlu1 %v2284_v45, %s1957_s12  ;;  %v1354_v35 = vld [vmem:[#allocation8 + $0x88] sm:$0xff] }
 0x1c8   :  { %v719_v21 = vpop.permute.xlu0 %718  ;;  %v1758_v57 = vpack.c.bf16 %v1354_v35, %v1353_v50  ;;  %v1355_v35 = vld [vmem:[#allocation8 + $0x90] sm:$0xff]  ;;  %v1356_v50 = vld [vmem:[#allocation8 + $0x98] sm:$0xff] }
 0x1c9   :  { %v883_v30 = vpop.permute.xlu1 %882 }
 0x1ca   :  { %v2541_v58 = vsel %vm628_vm4, %v875_v19, %v883_v30  ;;  %v2545_v23 = vsel %vm628_vm4, %v883_v30, %v859_v26  ;;  %1042 = vrot.lane.b32.xlu0 %v2307_v59, %s1957_s12  ;;  %v2558_v19 = vsel %vm2549_vm6, %v2295_v36, 0.0  ;;  %1759 = vmatprep.subr.bf16.mxu0 %v1758_v57  ;;  %v1792_v57 = vpack.c.bf16 %v1370_v41, %v1369_v56  ;;  %v1388_v56 = vld [vmem:[#allocation8 + $0x198] sm:$0xff] }
 0x1cb   :  { %3739 = vst [vmem:[#allocation55_spill] sm:$0xff] %v2541_v58  ;;  %3740 = vst [vmem:[#allocation56_spill] sm:$0xff] %v2545_v23  ;;  %618 = vrot.lane.b32.xlu1 %v2284_v45, %s1964_s2  ;;  %v1385_v45 = vld [vmem:[#allocation8 + $0x180] sm:$0xff] }
 0x1cc   :  { %v877_v15 = vpop.permute.xlu0 %876  ;;  %3743 = vst [vmem:[#allocation57_spill] sm:$0xff] %v2558_v19 }
 0x1cd   :  { %v711_v38 = vpop.permute.xlu1 %710 }
 0x1ce   :  { %v2562_v26 = vsel %vm470_vm5, %v711_v38, %v719_v21  ;;  %v2566_v30 = vsel %vm470_vm5, %v703_v16, %v711_v38  ;;  %436 = vrot.lane.b32.xlu0 %v2558_v19, %s1957_s12 }
 0x1cf   :  { %452 = vrot.lane.b32.xlu1 %v2573_v20, %s1957_s12 }
 0x1d0   :  { %v861_v36 = vpop.permute.xlu0 %860 }
 0x1d1   :  { %v727_v23 = vpop.permute.xlu1 %726 }
 0x1d2   :  { %v2579_v58 = vsel %vm470_vm5, %v719_v21, %v727_v23  ;;  %v2583_v38 = vsel %vm470_vm5, %v727_v23, %v703_v16  ;;  %596 = vrot.lane.b32.xlu0 %v2558_v19, %s1964_s2  ;;  %v3745_v21 = vrot.slane %v2276_v37, 7  ;;  %v1760_v23 = vpack.c.bf16 %v1338_v18, %v1337_v8  ;;  %v1386_v18 = vld [vmem:[#allocation8 + $0x188] sm:$0xff]  ;;  %v1339_v8 = vld [vmem:[#allocation8 + $0x10] sm:$0xff] }
 0x1d3   :  { %612 = vrot.lane.b32.xlu1 %v2573_v20, %s1964_s2  ;;  %v1790_v61 = vpack.c.bf16 %v1386_v18, %v1385_v45  ;;  %v1357_v45 = vld [vmem:[#allocation8 + $0xa0] sm:$0xff]  ;;  %v1387_v18 = vld [vmem:[#allocation8 + $0x190] sm:$0xff] }
 0x1d4   :  { %v2589_v3 = vpop.permute.xlu0 %454  ;;  %v2597_v16 = vsel %vm391_vm0, %v3746_v54, %v3745_v21  ;;  %1761 = vmatpush3.bf16.msra.mxu0 %v1760_v23  ;;  %v1762_v54 = vpack.c.bf16 %v1356_v50, %v1355_v35  ;;  %v1340_v21 = vld [vmem:[#allocation8 + $0x18] sm:$0xff]  ;;  %v370_v35 = vadd.s32 24, %v2082_v39  ;;  %v1358_v50 = vld [vmem:[#allocation8 + $0xa8] sm:$0xff] }
 0x1d5   :  { %v869_v2 = vpop.permute.xlu1 %868  ;;  %3747 = vst [vmem:[#allocation59_spill] sm:$0xff] %v2597_v16  ;;  %1791 = vmatprep.subr.bf16.mxu1 %v1790_v61  ;;  %v1766_v41 = vpack.c.bf16 %v1358_v50, %v1357_v45  ;;  %v804_v45 = vld [vmem:[#allocation7 + $0x4] ss:$8 sm:$0xf] }
 0x1d6   :  { %v2601_v20 = vsel %vm628_vm4, %v869_v2, %v877_v15  ;;  %v2605_v19 = vsel %vm628_vm4, %v861_v36, %v869_v2  ;;  %466 = vrot.lane.b32.xlu0 %v2597_v16, %s1957_s12  ;;  %v1764_v2 = vpack.c.bf16 %v1340_v21, %v1339_v8  ;;  %1763 = vmatprep.subr.bf16.mxu0 %v1762_v54  ;;  %v1342_v54 = vld [vmem:[#allocation8 + $0x28] sm:$0xff] }
 0x1d7   :  { %450 = vrot.lane.b32.xlu1 %v2313_v9, %s1957_s12  ;;  %v542_v8 = vld [vmem:[#allocation7 + $0x1] ss:$8 sm:$0xf]  ;;  %1793 = vmatpush3.bf16.msra.mxu1 %v1792_v57  ;;  %v374_v57 = vand.u32 15, %v370_v35  ;;  %v2657_v35 = vrot.slane %v804_v45, %v2094_v43 }
 0x1d8   :  { %v2611_v31 = vpop.permute.xlu0 %614  ;;  %1765 = vmatpush3.bf16.msra.mxu0 %v1764_v2  ;;  %v2636_v2 = vsel %vm977_vm1, %v3750_v14, %v3749_v12  ;;  %v2646_v39 = vrot.slane %v542_v8, %v2085_v40  ;;  %v2649_v12 = vrot.slane %v542_v8, %v2094_v43 }
 0x1d9   :  { %v885_v25 = vpop.permute.xlu1 %884  ;;  %3751 = vst [vmem:[#allocation61_spill] sm:$0xff] %v2636_v2  ;;  %1767 = vmatprep.subr.bf16.mxu0 %v1766_v41  ;;  %3756 = vst [vmem:[#allocation66_spill] sm:$0xff] %v2657_v35  ;;  %vm2688_vm7 = vcmp.lt.s32.totalorder %v374_v57, 15 }
 0x1da   :  { %v2615_v53 = vsel %vm628_vm4, %v877_v15, %v885_v25  ;;  %v2619_v23 = vsel %vm628_vm4, %v885_v25, %v861_v36  ;;  %610 = vrot.lane.b32.xlu0 %v2313_v9, %s1964_s2  ;;  %v1341_v15 = vld [vmem:[#allocation8 + $0x20] sm:$0xff]  ;;  %v1794_v36 = vpack.c.bf16 %v1388_v56, %v1387_v18  ;;  %v1371_v9 = vld [vmem:[#allocation8 + $0x110] sm:$0xff]  ;;  %v2641_v18 = vrot.slane %v542_v8, %v2091_v42 }
 0x1db   :  { %3748 = vst [vmem:[#allocation60_spill] sm:$0xff] %v2619_v23  ;;  %626 = vrot.lane.b32.xlu1 %v2597_v16, %s1964_s2  ;;  %v1768_v21 = vpack.c.bf16 %v1342_v54, %v1341_v15  ;;  %v1796_v50 = vpack.c.bf16 %v1372_v5, %v1371_v9  ;;  %v749_v56 = vld [vmem:[#allocation7 + $0x3] ss:$8 sm:$0xf]  ;;  %3753 = vst [vmem:[#allocation63_spill] sm:$0xff] %v2646_v39  ;;  %v2652_v9 = vrot.slane %v542_v8, %v2097_v0 }
 0x1dc   :  { %v2626_v25 = vpop.permute.xlu0 %598  ;;  %1795 = vmatprep.subr.bf16.mxu1 %v1794_v36  ;;  %3752 = vst [vmem:[#allocation62_spill] sm:$0xff] %v2641_v18  ;;  %3754 = vst [vmem:[#allocation64_spill] sm:$0xff] %v2649_v12  ;;  %v907_v5 = vld [vmem:[#allocation7 + $0x5] ss:$8 sm:$0xf]  ;;  %v2664_v15 = vsel %vm2549_vm6, %v2323_v62, 0.0  ;;  %v2667_v54 = vrot.slane %v804_v45, %v2091_v42  ;;  %v2670_v8 = vrot.slane %v804_v45, %v2085_v40 }
 0x1dd   :  { %v2628_v61 = vpop.permute.xlu1 %438  ;;  %1769 = vmatpush3.bf16.msra.mxu0 %v1768_v21  ;;  %3755 = vst [vmem:[#allocation65_spill] sm:$0xff] %v2652_v9  ;;  %1797 = vmatpush3.bf16.msra.mxu1 %v1796_v50  ;;  %3757 = vst [vmem:[#allocation67_spill] sm:$0xff] %v2664_v15  ;;  %v2673_v36 = vrot.slane %v804_v45, %v2097_v0  ;;  %v2676_v21 = vrot.slane %v749_v56, %v2094_v43  ;;  %v2686_v62 = vsel %vm2549_vm6, %v2331_v63, 0.0  ;;  %v487_v16 = vld [vmem:[#allocation7] ss:$8 sm:$0xf] }
 0x1de   :  { %1050 = vrot.lane.b32.xlu0 %v2636_v2, %s1957_s12  ;;  %3758 = vst [vmem:[#allocation68_spill] sm:$0xff] %v2667_v54  ;;  %v2679_v50 = vrot.slane %v749_v56, %v2091_v42  ;;  %3761 = vst [vmem:[#allocation71_spill] sm:$0xff] %v2686_v62  ;;  %v2693_v45 = vrot.slane %v907_v5, %v2085_v40  ;;  %v2696_v60 = vrot.slane %v907_v5, %v2094_v43  ;;  %v646_v63 = vld [vmem:[#allocation7 + $0x2] ss:$8 sm:$0xf] }
 0x1df   :  { %1034 = vrot.lane.b32.xlu1 %v2347_v32, %s1957_s12  ;;  %3759 = vst [vmem:[#allocation69_spill] sm:$0xff] %v2673_v36  ;;  %v2699_v49 = vrot.slane %v749_v56, %v2085_v40  ;;  %v2702_v29 = vrot.slane %v749_v56, %v2097_v0  ;;  %v570_v55 = vmul.f32 %v2641_v18, %v2157_v27  ;;  %v1374_v23 = vld [vmem:[#allocation8 + $0x128] sm:$0xff] }
 0x1e0   :  { %v2654_v14 = vpop.permute.xlu0 %1022  ;;  %3760 = vst [vmem:[#allocation70_spill] sm:$0xff] %v2679_v50  ;;  %v2710_v57 = vmul.f32 %v2646_v39, %v2145_v24  ;;  %v569_v34 = vmul.f32 %v2649_v12, %v2185_v46  ;;  %v2716_v13 = vmul.f32 %v2652_v9, %v2195_v47  ;;  %v2721_v7 = vrot.slane %v907_v5, %v2091_v42  ;;  %v1359_v12 = vld [vmem:[#allocation8 + $0xb0] sm:$0xff] }
 0x1e1   :  { %v2659_v41 = vpop.permute.xlu1 %1038  ;;  %3764 = vst [vmem:[#allocation72_spill] sm:$0xff] %v2702_v29  ;;  %v2724_v52 = vrot.slane %v907_v5, %v2097_v0  ;;  %v2729_v24 = vrot.slane %v487_v16, %v2094_v43  ;;  %v2733_v46 = vmul.f32 %v2657_v35, %v2128_v11  ;;  %v2738_v47 = vrot.slane %v487_v16, %v2091_v42  ;;  %v1360_v11 = vld [vmem:[#allocation8 + $0xb8] sm:$0xff]  ;;  %v1389_v35 = vld [vmem:[#allocation8 + $0x1a0] sm:$0xff] }
 0x1e2   :  { %444 = vrot.lane.b32.xlu0 %v2664_v15, %s1957_s12  ;;  %v2741_v9 = vrot.slane %v646_v63, %v2085_v40  ;;  %v2745_v5 = vmul.f32 %v2667_v54, %v2123_v6  ;;  %v2749_v18 = vmul.f32 %v2673_v36, %v2134_v17  ;;  %v2757_v39 = vrot.slane %v487_v16, %v2085_v40  ;;  %v1390_v54 = vld [vmem:[#allocation8 + $0x1a8] sm:$0xff]  ;;  %v1344_v17 = vld [vmem:[#allocation8 + $0x38] sm:$0xff] }
 0x1e3   :  { %460 = vrot.lane.b32.xlu1 %v2686_v62, %s1957_s12  ;;  %3765 = vst [vmem:[#allocation73_spill] sm:$0xff] %v2724_v52  ;;  %3766 = vst [vmem:[#allocation74_spill] sm:$0xff] %v2729_v24  ;;  %v2760_v28 = vrot.slane %v487_v16, %v2097_v0  ;;  %v1770_v6 = vpack.c.bf16 %v1360_v11, %v1359_v12  ;;  %v2766_v2 = vrot.slane %v646_v63, %v2097_v0  ;;  %v1373_v52 = vld [vmem:[#allocation8 + $0x120] sm:$0xff] }
 0x1e4   :  { %v2718_v56 = vpop.permute.xlu0 %1180  ;;  %3767 = vst [vmem:[#allocation75_spill] sm:$0xff] %v2738_v47  ;;  %3768 = vst [vmem:[#allocation76_spill] sm:$0xff] %v2741_v9  ;;  %v776_v40 = vmul.f32 %v2676_v21, %v2566_v30 }
 0x1e5   :  { %v2726_v27 = vpop.permute.xlu1 %1196  ;;  %3769 = vst [vmem:[#allocation77_spill] sm:$0xff] %v2749_v18  ;;  %3771 = vst [vmem:[#allocation79_spill] sm:$0xff] %v2757_v39  ;;  %v2763_v18 = vrot.slane %v646_v63, %v2091_v42  ;;  %1771 = vmatprep.subr.bf16.mxu0 %v1770_v6  ;;  %v1800_v42 = vpack.c.bf16 %v1374_v23, %v1373_v52  ;;  %v775_v52 = vmul.f32 %v2699_v49, %v2583_v38  ;;  %v1362_v38 = vld [vmem:[#allocation8 + $0xc8] sm:$0xff] }
 0x1e6   :  { %604 = vrot.lane.b32.xlu0 %v2664_v15, %s1964_s2  ;;  %v2754_v15 = vrot.slane %v646_v63, %v2094_v43  ;;  %3772 = vst [vmem:[#allocation80_spill] sm:$0xff] %v2760_v28  ;;  %3774 = vst [vmem:[#allocation82_spill] sm:$0xff] %v2766_v2  ;;  %v1772_v43 = vpack.c.bf16 %v1344_v17, %v1343_v10  ;;  %v778_v23 = vmul.f32 %v2702_v29, %v2579_v58 }
 0x1e7   :  { %888 = vrot.lane.b32.xlu1 %v2276_v37, %s1964_s2  ;;  %3773 = vst [vmem:[#allocation81_spill] sm:$0xff] %v2763_v18  ;;  %v1798_v37 = vpack.c.bf16 %v1390_v54, %v1389_v35  ;;  %v777_v54 = vmul.f32 %v2679_v50, %v2562_v26  ;;  %v1361_v26 = vld [vmem:[#allocation8 + $0xc0] sm:$0xff] }
 0x1e8   :  { %3770 = vst [vmem:[#allocation78_spill] sm:$0xff] %v2754_v15  ;;  %v447_v36 = vpop.permute.xlu0 %446  ;;  %1773 = vmatpush3.bf16.msra.mxu0 %v1772_v43 }
 0x1e9   :  { %v476_v16 = vsel %vm470_vm5, %v447_v36, %v2589_v3  ;;  %v480_v12 = vsel %vm470_vm5, %v2628_v61, %v447_v36  ;;  %v607_v11 = vpop.permute.xlu1 %606  ;;  %1799 = vmatprep.subr.bf16.mxu1 %v1798_v37 }
 0x1ea   :  { %v514_v63 = vmul.f32 %v2729_v24, %v480_v12  ;;  %v515_v10 = vmul.f32 %v2738_v47, %v476_v16  ;;  %v634_v35 = vsel %vm628_vm4, %v607_v11, %v2611_v31  ;;  %v638_v30 = vsel %vm628_vm4, %v2626_v25, %v607_v11  ;;  %864 = vrot.lane.b32.xlu0 %v2215_v1, %s1964_s2  ;;  %v1391_v11 = vld [vmem:[#allocation8 + $0x1b0] sm:$0xff] }
 0x1eb   :  { %620 = vrot.lane.b32.xlu1 %v2686_v62, %s1964_s2  ;;  %v673_v17 = vmul.f32 %v2754_v15, %v634_v35  ;;  %v2798_v12 = vsel %vm2688_vm7, %v2337_v22, 0.0  ;;  %1801 = vmatpush3.bf16.msra.mxu1 %v1800_v42  ;;  %v672_v58 = vmul.f32 %v2741_v9, %v638_v30  ;;  %v1345_v22 = vld [vmem:[#allocation8 + $0x40] sm:$0xff]  ;;  %v1346_v35 = vld [vmem:[#allocation8 + $0x48] sm:$0xff]  ;;  %v1376_v62 = vld [vmem:[#allocation8 + $0x138] sm:$0xff] }
 0x1ec   :  { %v585_v36 = vadd.f32 %v569_v34, %v514_v63  ;;  %v586_v6 = vadd.f32 %v570_v55, %v515_v10  ;;  %v463_v16 = vpop.permute.xlu0 %462  ;;  %v1774_v63 = vpack.c.bf16 %v1362_v38, %v1361_v26  ;;  %v1392_v10 = vld [vmem:[#allocation8 + $0x1b8] sm:$0xff] }
 0x1ed   :  { %v472_v37 = vsel %vm470_vm5, %v2589_v3, %v463_v16  ;;  %v484_v34 = vsel %vm470_vm5, %v463_v16, %v2628_v61  ;;  %v623_v55 = vpop.permute.xlu1 %622  ;;  %v1375_v3 = vld [vmem:[#allocation8 + $0x130] sm:$0xff]  ;;  %v1364_v26 = vld [vmem:[#allocation8 + $0xd8] sm:$0xff] }
 0x1ee   :  { %v689_v43 = vadd.f32 %v673_v17, %v585_v36  ;;  %v513_v42 = vmul.f32 %v2757_v39, %v484_v34  ;;  %v516_v1 = vmul.f32 %v2760_v28, %v472_v37  ;;  %v630_v30 = vsel %vm628_vm4, %v2611_v31, %v623_v55  ;;  %1028 = vrot.lane.b32.xlu0 %v2798_v12, %s1957_s12  ;;  %v1363_v61 = vld [vmem:[#allocation8 + $0xd0] sm:$0xff] }
 0x1ef   :  { %v642_v16 = vsel %vm628_vm4, %v623_v55, %v2626_v25  ;;  %v674_v36 = vmul.f32 %v2763_v18, %v630_v30  ;;  %1200 = vrot.lane.b32.xlu1 %v2307_v59, %s1964_s2  ;;  %1775 = vmatprep.subr.bf16.mxu0 %v1774_v63  ;;  %v1802_v17 = vpack.c.bf16 %v1392_v10, %v1391_v11  ;;  %v1393_v18 = vld [vmem:[#allocation8 + $0x1c0] sm:$0xff]  ;;  %v1394_v59 = vld [vmem:[#allocation8 + $0x1c8] sm:$0xff] }
 0x1f0   :  { %v792_v38 = vadd.f32 %v776_v40, %v689_v43  ;;  %v584_v31 = vadd.f32 %v2710_v57, %v513_v42  ;;  %v587_v37 = vadd.f32 %v2716_v13, %v516_v1  ;;  %v675_v34 = vmul.f32 %v2766_v2, %v642_v16  ;;  %v2823_v0 = vpop.permute.xlu0 %720  ;;  %v1348_v43 = vld [vmem:[#allocation8 + $0x58] sm:$0xff] }
 0x1f1   :  { %v690_v29 = vadd.f32 %v674_v36, %v586_v6  ;;  %v1031_v50 = vpop.permute.xlu1 %1030  ;;  %1803 = vmatprep.subr.bf16.mxu1 %v1802_v17  ;;  %v1776_v25 = vpack.c.bf16 %v1346_v35, %v1345_v22  ;;  %v1804_v55 = vpack.c.bf16 %v1376_v62, %v1375_v3  ;;  %v1778_v30 = vpack.c.bf16 %v1364_v26, %v1363_v61  ;;  %v1347_v35 = vld [vmem:[#allocation8 + $0x50] sm:$0xff]  ;;  %v1396_v16 = vld [vmem:[#allocation8 + $0x1d8] sm:$0xff]  ;;  %v3781_v17 = vld [vmem:[#allocation60_spill] sm:$0xff] }
 0x1f2   :  { %v688_v63 = vadd.f32 %v672_v58, %v584_v31  ;;  %v691_v11 = vadd.f32 %v675_v34, %v587_v37  ;;  %v2828_v40 = vsel %vm470_vm5, %v1031_v50, %v2659_v41  ;;  %v2833_v1 = vsel %vm470_vm5, %v2654_v14, %v1031_v50  ;;  %1192 = vrot.lane.b32.xlu0 %v2347_v32, %s1964_s2  ;;  %v1395_v61 = vld [vmem:[#allocation8 + $0x1d0] sm:$0xff]  ;;  %v1349_v34 = vld [vmem:[#allocation8 + $0x60] sm:$0xff] }
 0x1f3   :  { %3775 = vst [vmem:[#allocation83_spill] sm:$0xff] %v2828_v40  ;;  %3776 = vst [vmem:[#allocation84_spill] sm:$0xff] %v2833_v1  ;;  %v934_v13 = vmul.f32 %v2696_v60, %v2601_v20  ;;  %v935_v62 = vmul.f32 %v2721_v7, %v2615_v53  ;;  %v793_v57 = vadd.f32 %v777_v54, %v690_v29  ;;  %1184 = vrot.lane.b32.xlu1 %v2280_v44, %s1964_s2  ;;  %v1377_v53 = vld [vmem:[#allocation8 + $0x140] sm:$0xff]  ;;  %v3782_v26 = vld [vmem:[#allocation73_spill] sm:$0xff] }
 0x1f4   :  { %v847_v6 = vadd.f32 %v2733_v46, %v792_v38  ;;  %v791_v58 = vadd.f32 %v775_v52, %v688_v63  ;;  %v794_v10 = vadd.f32 %v778_v23, %v691_v11  ;;  %v1189_v22 = vpop.permute.xlu0 %1188  ;;  %v2847_v50 = vsel %vm2688_vm7, %v2343_v33, 0.0  ;;  %1777 = vmatpush3.bf16.msra.mxu0 %v1776_v25  ;;  %1805 = vmatpush3.bf16.msra.mxu1 %v1804_v55  ;;  %v1366_v23 = vld [vmem:[#allocation8 + $0xe8] sm:$0xff]  ;;  %v3783_v38 = vld [vmem:[#allocation61_spill] sm:$0xff] }
 0x1f5   :  { %v1806_v20 = vpack.c.bf16 %v1394_v59, %v1393_v18  ;;  %v2852_v29 = vsel %vm628_vm4, %v1189_v22, %v2726_v27  ;;  %v2857_v46 = vsel %vm628_vm4, %v2718_v56, %v1189_v22  ;;  %v1047_v54 = vpop.permute.xlu1 %1046  ;;  %v848_v33 = vadd.f32 %v2745_v5, %v793_v57  ;;  %1779 = vmatprep.subr.bf16.mxu0 %v1778_v30  ;;  %v1378_v59 = vld [vmem:[#allocation8 + $0x148] sm:$0xff]  ;;  %v1365_v18 = vld [vmem:[#allocation8 + $0xe0] sm:$0xff]  ;;  %v1367_v57 = vld [vmem:[#allocation8 + $0xf0] sm:$0xff] }
 0x1f6   :  { %3777 = vst [vmem:[#allocation85_spill] sm:$0xff] %v2852_v29  ;;  %3778 = vst [vmem:[#allocation86_spill] sm:$0xff] %v2857_v46  ;;  %v2860_v52 = vadd.f32 %v934_v13, %v847_v6  ;;  %v2865_v42 = vsel %vm470_vm5, %v2659_v41, %v1047_v54  ;;  %v2870_v3 = vsel %vm470_vm5, %v1047_v54, %v2654_v14  ;;  %1044 = vrot.lane.b32.xlu0 %v2847_v50, %s1957_s12  ;;  %v3784_v14 = vld [vmem:[#allocation77_spill] sm:$0xff]  ;;  %v1350_v25 = vld [vmem:[#allocation8 + $0x68] sm:$0xff] }
 0x1f7   :  { %3779 = vst [vmem:[#allocation87_spill] sm:$0xff] %v2865_v42  ;;  %3780 = vst [vmem:[#allocation88_spill] sm:$0xff] %v2870_v3  ;;  %v830_v5 = vmul.f32 %v2670_v8, %v2120_v4  ;;  %v933_v36 = vmul.f32 %v2693_v45, %v2605_v19  ;;  %v936_v41 = vmul.f32 %v3782_v26, %v3781_v17  ;;  %1208 = vrot.lane.b32.xlu1 %v3783_v38, %s1964_s2  ;;  %v1379_v13 = vld [vmem:[#allocation8 + $0x150] sm:$0xff]  ;;  %v1380_v19 = vld [vmem:[#allocation8 + $0x158] sm:$0xff] }
 0x1f8   :  { %v2882_v31 = vadd.f32 %v935_v62, %v848_v33  ;;  %v849_v37 = vadd.f32 %v3784_v14, %v794_v10  ;;  %v713_v55 = vpop.permute.xlu0 %712  ;;  %1807 = vmatprep.subr.bf16.mxu1 %v1806_v20  ;;  %v1780_v4 = vpack.c.bf16 %v1348_v43, %v1347_v35  ;;  %v1808_v63 = vpack.c.bf16 %v1378_v59, %v1377_v53  ;;  %v3785_v22 = vld [vmem:[#allocation39_spill] sm:$0xff]  ;;  %v1368_v20 = vld [vmem:[#allocation8 + $0xf8] sm:$0xff]  ;;  %v1398_v43 = vld [vmem:[#allocation8 + $0x1e8] sm:$0xff] }
 0x1f9   :  { %v846_v30 = vadd.f32 %v830_v5, %v791_v58  ;;  %v1782_v11 = vpack.c.bf16 %v1366_v23, %v1365_v18  ;;  %v2888_v6 = vsel %vm470_vm5, %v713_v55, %v2823_v0  ;;  %v705_v62 = vpop.permute.xlu1 %704  ;;  %v2893_v10 = vsel %vm2688_vm7, %v3785_v22, 0.0  ;;  %v1397_v35 = vld [vmem:[#allocation8 + $0x1e0] sm:$0xff]  ;;  %v3786_v33 = vld [vmem:[#allocation40_spill] sm:$0xff]  ;;  %v1399_v22 = vld [vmem:[#allocation8 + $0x1f0] sm:$0xff] }
 0x1fa   :  { %v2895_v54 = vadd.f32 %v936_v41, %v849_v37  ;;  %v1810_v58 = vpack.c.bf16 %v1396_v16, %v1395_v61  ;;  %v2899_v53 = vsel %vm470_vm5, %v705_v62, %v713_v55  ;;  %1052 = vrot.lane.b32.xlu0 %v2893_v10, %s1957_s12  ;;  %v2906_v59 = vsel %vm2688_vm7, %v3786_v33, 0.0  ;;  %1781 = vmatpush3.bf16.msra.mxu0 %v1780_v4  ;;  %v1351_v61 = vld [vmem:[#allocation8 + $0x70] sm:$0xff]  ;;  %v1352_v16 = vld [vmem:[#allocation8 + $0x78] sm:$0xff]  ;;  %v1381_v37 = vld [vmem:[#allocation8 + $0x160] sm:$0xff] }
 0x1fb   :  { %v2908_v18 = vadd.f32 %v933_v36, %v846_v30  ;;  %v1784_v23 = vpack.c.bf16 %v1350_v25, %v1349_v34  ;;  %1036 = vrot.lane.b32.xlu1 %v2906_v59, %s1957_s12  ;;  %1809 = vmatpush3.bf16.msra.mxu1 %v1808_v63  ;;  %v1812_v5 = vpack.c.bf16 %v1380_v19, %v1379_v13  ;;  %v1400_v36 = vld [vmem:[#allocation8 + $0x1f8] sm:$0xff]  ;;  %v3795_v42 = vld [vmem:[#allocation45_spill] sm:$0xff]  ;;  %v3800_v29 = vld [vmem:[#allocation27_spill] sm:$0xff] }
 0x1fc   :  { %v871_v17 = vpop.permute.xlu0 %870  ;;  %1783 = vmatprep.subr.bf16.mxu0 %v1782_v11  ;;  %1811 = vmatprep.subr.bf16.mxu1 %v1810_v58  ;;  %v1786_v41 = vpack.c.bf16 %v1368_v20, %v1367_v57  ;;  %v1814_v14 = vpack.c.bf16 %v1398_v43, %v1397_v35  ;;  %v1788_v25 = vpack.c.bf16 %v1352_v16, %v1351_v61  ;;  %v1383_v11 = vld [vmem:[#allocation8 + $0x170] sm:$0xff]  ;;  %v1384_v13 = vld [vmem:[#allocation8 + $0x178] sm:$0xff] }
 0x1fd   :  { %v879_v55 = vpop.permute.xlu1 %878  ;;  %v1816_v30 = vpack.c.bf16 %v1382_v48, %v1381_v37  ;;  %v1818_v63 = vpack.c.bf16 %v1400_v36, %v1399_v22  ;;  %v1820_v20 = vpack.c.bf16 %v1384_v13, %v1383_v11  ;;  %v3791_v13 = vld [vmem:[#allocation41_spill] sm:$0xff]  ;;  %v3801_v46 = vld [vmem:[#allocation66_spill] sm:$0xff] }
 0x1fe   :  { %v2914_v34 = vsel %vm628_vm4, %v871_v17, %v879_v55  ;;  %1194 = vrot.lane.b32.xlu0 %v2906_v59, %s1964_s2  ;;  %1785 = vmatpush3.bf16.msra.mxu0 %v1784_v23  ;;  %v3802_v40 = vld [vmem:[#allocation81_spill] sm:$0xff] }
 0x1ff   :  { %1202 = vrot.lane.b32.xlu1 %v2847_v50, %s1964_s2  ;;  %1813 = vmatpush3.bf16.msra.mxu1 %v1812_v5  ;;  %v1071_v1 = vld [vmem:[#allocation7 + $0x6] ss:$8 sm:$0xf] }
 0x200   :  { %v2920_v4 = vpop.permute.xlu0 %600  ;;  %1787 = vmatprep.subr.bf16.mxu0 %v1786_v41  ;;  %1815 = vmatprep.subr.bf16.mxu1 %v1814_v14 }
 0x201   :  { %v1205_v19 = vpop.permute.xlu1 %1204 }
 0x202   :  { %v2925_v57 = vsel %vm628_vm4, %v2726_v27, %v1205_v19  ;;  %v2930_v58 = vsel %vm628_vm4, %v1205_v19, %v2718_v56  ;;  %1186 = vrot.lane.b32.xlu0 %v2798_v12, %s1964_s2  ;;  %1789 = vmatpush3.bf16.msra.mxu0 %v1788_v25  ;;  %v3792_v19 = vld [vmem:[#allocation63_spill] sm:$0xff] }
 0x203   :  { %3787 = vst [vmem:[#allocation60_spill] sm:$0xff] %v2925_v57  ;;  %3788 = vst [vmem:[#allocation61_spill] sm:$0xff] %v2930_v58  ;;  %1210 = vrot.lane.b32.xlu1 %v2893_v10, %s1964_s2  ;;  %1817 = vmatpush3.bf16.msra.mxu1 %v1816_v30 }
 0x204   :  { %v2936_v35 = vpop.permute.xlu0 %1024  ;;  %1819 = vmatprep.subr.bf16.mxu1 %v1818_v63 }
 0x205   :  { %v863_v43 = vpop.permute.xlu1 %862 }
 0x206   :  { %v900_v27 = vsel %vm628_vm4, %v863_v43, %v871_v17 }
 0x207   :  { %1821 = vmatpush3.bf16.msra.mxu1 %v1820_v20  ;;  %v572_v20 = vmul.f32 %v3792_v19, %v3791_v13 }
 0x208   :  { %v2940_v33 = vpop.permute.xlu0 %706 }
 0x209   :  { %3789 = vst [vmem:[#allocation77_spill] sm:$0xff] %v2940_v33  ;;  %v729_v56 = vpop.permute.xlu1 %728 }
 0x20a   :  { %v734_v23 = vsel %vm470_vm5, %v2823_v0, %v729_v56  ;;  %v746_v5 = vsel %vm470_vm5, %v729_v56, %v705_v62  ;;  %v3794_v56 = vld [vmem:[#allocation64_spill] sm:$0xff] }
 0x20c   :  { %v2947_v61 = vpop.permute.xlu0 %1040 }
 0x20d   :  { %v887_v16 = vpop.permute.xlu1 %886 }
 0x20e   :  { %v2951_v41 = vsel %vm628_vm4, %v879_v55, %v887_v16  ;;  %v2955_v17 = vsel %vm628_vm4, %v887_v16, %v863_v43  ;;  %v3793_v43 = vld [vmem:[#allocation44_spill] sm:$0xff] }
 0x20f   :  { %v573_v16 = vmul.f32 %v3794_v56, %v3793_v43 }
 0x210   :  { %v2957_v14 = vpop.permute.xlu0 %722 }
 0x211   :  { %3790 = vst [vmem:[#allocation39_spill] sm:$0xff] %v2957_v14  ;;  %v441_v37 = vpop.permute.xlu1 %440 }
 0x214   :  { %v449_v48 = vpop.permute.xlu0 %448 }
 0x215   :  { %v481_v0 = vsel %vm470_vm5, %v441_v37, %v449_v48  ;;  %v457_v22 = vpop.permute.xlu1 %456 }
 0x216   :  { %v477_v62 = vsel %vm470_vm5, %v449_v48, %v457_v22  ;;  %v518_v63 = vmul.f32 %v2729_v24, %v481_v0  ;;  %v3799_v24 = vld [vmem:[#allocation24_spill] sm:$0xff] }
 0x217   :  { %v519_v48 = vmul.f32 %v2738_v47, %v477_v62  ;;  %v3797_v47 = vld [vmem:[#allocation46_spill] sm:$0xff]  ;;  %v834_v3 = vmul.f32 %v2670_v8, %v3799_v24 }
 0x218   :  { %v465_v36 = vpop.permute.xlu0 %464 }
 0x219   :  { %v473_v55 = vsel %vm470_vm5, %v457_v22, %v465_v36  ;;  %v485_v25 = vsel %vm470_vm5, %v465_v36, %v441_v37  ;;  %v617_v30 = vpop.permute.xlu1 %616  ;;  %v589_v36 = vadd.f32 %v573_v16, %v518_v63  ;;  %v780_v63 = vmul.f32 %v2676_v21, %v2899_v53 }
 0x21a   :  { %v517_v11 = vmul.f32 %v2757_v39, %v485_v25  ;;  %v520_v57 = vmul.f32 %v2760_v28, %v473_v55  ;;  %v3796_v39 = vld [vmem:[#allocation62_spill] sm:$0xff]  ;;  %v3798_v55 = vld [vmem:[#allocation65_spill] sm:$0xff] }
 0x21b   :  { %v574_v62 = vmul.f32 %v3796_v39, %v3795_v42  ;;  %v575_v28 = vmul.f32 %v3798_v55, %v3797_v47 }
 0x21c   :  { %v609_v58 = vpop.permute.xlu0 %608  ;;  %v588_v25 = vadd.f32 %v572_v20, %v517_v11  ;;  %v779_v11 = vmul.f32 %v2699_v49, %v746_v5 }
 0x21d   :  { %v635_v22 = vsel %vm628_vm4, %v609_v58, %v617_v30  ;;  %v639_v37 = vsel %vm628_vm4, %v2920_v4, %v609_v58  ;;  %v2980_v0 = vpop.permute.xlu1 %1198  ;;  %v835_v58 = vmul.f32 %v3801_v46, %v3800_v29 }
 0x21e   :  { %v676_v13 = vmul.f32 %v2741_v9, %v639_v37  ;;  %v677_v43 = vmul.f32 %v2754_v15, %v635_v22  ;;  %v590_v37 = vadd.f32 %v574_v62, %v519_v48  ;;  %v591_v9 = vadd.f32 %v575_v28, %v520_v57  ;;  %v3804_v48 = vld [vmem:[#allocation72_spill] sm:$0xff] }
 0x21f   :  { %v782_v28 = vmul.f32 %v3804_v48, %v734_v23  ;;  %v3807_v23 = vld [vmem:[#allocation29_spill] sm:$0xff] }
 0x220   :  { %v692_v20 = vadd.f32 %v676_v13, %v588_v25  ;;  %v693_v16 = vadd.f32 %v677_v43, %v589_v36  ;;  %v625_v22 = vpop.permute.xlu0 %624  ;;  %v3803_v36 = vld [vmem:[#allocation70_spill] sm:$0xff] }
 0x221   :  { %v631_v42 = vsel %vm628_vm4, %v617_v30, %v625_v22  ;;  %v643_v24 = vsel %vm628_vm4, %v625_v22, %v2920_v4  ;;  %v3000_v47 = vpop.permute.xlu1 %1182  ;;  %v781_v25 = vmul.f32 %v3803_v36, %v2888_v6  ;;  %v938_v4 = vmul.f32 %v2696_v60, %v2914_v34  ;;  %v3809_v34 = vld [vmem:[#allocation26_spill] sm:$0xff] }
 0x222   :  { %v795_v29 = vadd.f32 %v779_v11, %v692_v20  ;;  %v796_v15 = vadd.f32 %v780_v63, %v693_v16  ;;  %v678_v53 = vmul.f32 %v3802_v40, %v631_v42  ;;  %v679_v5 = vmul.f32 %v2766_v2, %v643_v24  ;;  %v3810_v16 = vld [vmem:[#allocation68_spill] sm:$0xff]  ;;  %v3813_v24 = vld [vmem:[#allocation17_spill] sm:$0xff]  ;;  %v3822_v2 = vld [vmem:[#allocation15_spill] sm:$0xff] }
 0x223   :  { %v937_v63 = vmul.f32 %v2693_v45, %v900_v27  ;;  %v836_v27 = vmul.f32 %v3810_v16, %v3809_v34  ;;  %v1126_v22 = vld [vmem:[#allocation7 + $0x7] ss:$8 sm:$0xf] }
 0x224   :  { %v694_v57 = vadd.f32 %v678_v53, %v590_v37  ;;  %v695_v13 = vadd.f32 %v679_v5, %v591_v9  ;;  %v731_v30 = vpop.permute.xlu0 %730  ;;  %v850_v43 = vadd.f32 %v834_v3, %v795_v29  ;;  %v851_v62 = vadd.f32 %v835_v58, %v796_v15  ;;  %v3808_v58 = vld [vmem:[#allocation69_spill] sm:$0xff]  ;;  %v3815_v53 = vld [vmem:[#allocation16_spill] sm:$0xff] }
 0x225   :  { %v3013_v11 = vsel %vm470_vm5, %v2957_v14, %v731_v30  ;;  %v3018_v6 = vsel %vm470_vm5, %v731_v30, %v2940_v33  ;;  %v3020_v9 = vpop.permute.xlu1 %880  ;;  %v837_v20 = vmul.f32 %v3808_v58, %v3807_v23  ;;  %v3031_v29 = vrot.slane %v1071_v1, %v3813_v24  ;;  %v3828_v40 = vld [vmem:[#allocation48_spill] sm:$0xff] }
 0x226   :  { %3805 = vst [vmem:[#allocation40_spill] sm:$0xff] %v3013_v11  ;;  %3806 = vst [vmem:[#allocation41_spill] sm:$0xff] %v3018_v6  ;;  %v797_v3 = vadd.f32 %v781_v25, %v694_v57  ;;  %v798_v15 = vadd.f32 %v782_v28, %v695_v13  ;;  %v3026_v37 = vadd.f32 %v937_v63, %v850_v43  ;;  %v1229_v57 = vld [vmem:[#allocation7 + $0x20] ss:$8 sm:$0xf] }
 0x227   :  { %v3028_v42 = vadd.f32 %v938_v4, %v851_v62  ;;  %3814 = vst [vmem:[#allocation64_spill] sm:$0xff] %v3031_v29  ;;  %v3034_v5 = vrot.slane %v1071_v1, %v3815_v53  ;;  %v939_v13 = vmul.f32 %v2721_v7, %v2951_v41  ;;  %v940_v23 = vmul.f32 %v3782_v26, %v2955_v17 }
 0x228   :  { %3811 = vst [vmem:[#allocation63_spill] sm:$0xff] %v3026_v37  ;;  %v1191_v30 = vpop.permute.xlu0 %1190  ;;  %v853_v25 = vadd.f32 %v837_v20, %v798_v15  ;;  %v852_v28 = vadd.f32 %v836_v27, %v797_v3  ;;  %v3047_v63 = vrot.slane %v1126_v22, %v3813_v24  ;;  %v3819_v27 = vld [vmem:[#allocation47_spill] sm:$0xff]  ;;  %v3069_v11 = vrot.slane %v1071_v1, %v3822_v2 }
 0x229   :  { %3812 = vst [vmem:[#allocation44_spill] sm:$0xff] %v3028_v42  ;;  %3816 = vst [vmem:[#allocation45_spill] sm:$0xff] %v3034_v5  ;;  %v1217_v43 = vsel %vm628_vm4, %v1191_v30, %v2980_v0  ;;  %v1221_v62 = vsel %vm628_vm4, %v3000_v47, %v1191_v30  ;;  %v1033_v4 = vpop.permute.xlu1 %1032  ;;  %v3064_v42 = vrot.slane %v1229_v57, %v3813_v24 }
 0x22a   :  { %v1059_v3 = vsel %vm470_vm5, %v1033_v4, %v2947_v61  ;;  %v1063_v41 = vsel %vm470_vm5, %v2936_v35, %v1033_v4  ;;  %v3057_v20 = vadd.f32 %v940_v23, %v853_v25  ;;  %v3059_v34 = vadd.f32 %v939_v13, %v852_v28  ;;  %v3823_v4 = vld [vmem:[#allocation18_spill] sm:$0xff] }
 0x22b   :  { %v1098_v17 = vmul.f32 %v3031_v29, %v1063_v41  ;;  %v1099_v15 = vmul.f32 %v3034_v5, %v1059_v3  ;;  %v1153_v30 = vmul.f32 %v3047_v63, %v3819_v27  ;;  %3820 = vst [vmem:[#allocation65_spill] sm:$0xff] %v3064_v42  ;;  %v3072_v6 = vrot.slane %v1071_v1, %v3823_v4 }
 0x22c   :  { %3817 = vst [vmem:[#allocation62_spill] sm:$0xff] %v3057_v20  ;;  %3818 = vst [vmem:[#allocation46_spill] sm:$0xff] %v3059_v34  ;;  %v3066_v37 = vpop.permute.xlu0 %872  ;;  %v1131_v13 = vrot.slane %v1126_v22, %v3822_v2  ;;  %v1256_v27 = vmul.f32 %v3064_v42, %v1217_v43  ;;  %v3090_v20 = vrot.slane %v1229_v57, %v3822_v2 }
 0x22d   :  { %3821 = vst [vmem:[#allocation24_spill] sm:$0xff] %v3066_v37  ;;  %3824 = vst [vmem:[#allocation27_spill] sm:$0xff] %v3072_v6  ;;  %v1114_v3 = vadd.f32 %v1098_v17, %v2860_v52  ;;  %v1115_v25 = vadd.f32 %v1099_v15, %v2882_v31  ;;  %v1049_v28 = vpop.permute.xlu1 %1048  ;;  %v3825_v17 = vld [vmem:[#allocation42_spill] sm:$0xff]  ;;  %v1139_v43 = vrot.slane %v1126_v22, %v3815_v53 }
 0x22e   :  { %v1055_v23 = vsel %vm470_vm5, %v2947_v61, %v1049_v28  ;;  %v1067_v41 = vsel %vm470_vm5, %v1049_v28, %v2936_v35  ;;  %v1152_v31 = vmul.f32 %v1131_v13, %v3825_v17  ;;  %3826 = vst [vmem:[#allocation66_spill] sm:$0xff] %v3090_v20 }
 0x22f   :  { %v1169_v34 = vadd.f32 %v1153_v30, %v1114_v3  ;;  %v1097_v1 = vmul.f32 %v3069_v11, %v1067_v41  ;;  %v1100_v52 = vmul.f32 %v3072_v6, %v1055_v23  ;;  %v1143_v30 = vrot.slane %v1126_v22, %v3823_v4  ;;  %v3827_v23 = vld [vmem:[#allocation43_spill] sm:$0xff] }
 0x230   :  { %v3087_v15 = vpop.permute.xlu0 %442  ;;  %v1255_v3 = vmul.f32 %v3090_v20, %v1221_v62  ;;  %v1154_v41 = vmul.f32 %v1139_v43, %v3827_v23 }
 0x231   :  { %v1113_v61 = vadd.f32 %v1097_v1, %v2908_v18  ;;  %v1116_v14 = vadd.f32 %v1100_v52, %v2895_v54  ;;  %v3094_v33 = vpop.permute.xlu1 %714  ;;  %v3096_v35 = vadd.f32 %v1256_v27, %v1169_v34  ;;  %v1155_v37 = vmul.f32 %v1143_v30, %v3828_v40 }
 0x232   :  { %v3106_v18 = vrot.slane %v1229_v57, %v3815_v53  ;;  %v3109_v54 = vrot.slane %v1229_v57, %v3823_v4  ;;  %v1170_v1 = vadd.f32 %v1154_v41, %v1115_v25  ;;  %v3837_v41 = vld [vmem:[#allocation28_spill] sm:$0xff] }
 0x233   :  { %v1168_v28 = vadd.f32 %v1152_v31, %v1113_v61  ;;  %v1171_v52 = vadd.f32 %v1155_v37, %v1116_v14  ;;  %v3835_v37 = vld [vmem:[#allocation25_spill] sm:$0xff] }
 0x234   :  { %v3102_v17 = vpop.permute.xlu0 %602  ;;  %3829 = vst [vmem:[#allocation70_spill] sm:$0xff] %v3106_v18  ;;  %3830 = vst [vmem:[#allocation72_spill] sm:$0xff] %v3109_v54  ;;  %v3139_v25 = vmul.f32 %v1139_v43, %v3835_v37 }
 0x235   :  { %v1207_v34 = vpop.permute.xlu1 %1206  ;;  %v3111_v27 = vadd.f32 %v1255_v3, %v1168_v28 }
 0x236   :  { %v1213_v22 = vsel %vm628_vm4, %v2980_v0, %v1207_v34  ;;  %v1225_v62 = vsel %vm628_vm4, %v1207_v34, %v3000_v47  ;;  %v3833_v47 = vld [vmem:[#allocation23_spill] sm:$0xff]  ;;  %3836 = vst [vmem:[#allocation68_spill] sm:$0xff] %v3139_v25  ;;  %v3143_v34 = vmul.f32 %v3047_v63, %v3837_v41  ;;  %v3844_v25 = vld [vmem:[#allocation37_spill] sm:$0xff] }
 0x237   :  { %3831 = vst [vmem:[#allocation29_spill] sm:$0xff] %v3111_v27  ;;  %v1257_v40 = vmul.f32 %v3106_v18, %v1213_v22  ;;  %v1258_v31 = vmul.f32 %v3109_v54, %v1225_v62  ;;  %v3136_v14 = vmul.f32 %v1131_v13, %v3833_v47  ;;  %v3839_v62 = vld [vmem:[#allocation30_spill] sm:$0xff]  ;;  %v3843_v47 = vld [vmem:[#allocation36_spill] sm:$0xff]  ;;  %v3846_v41 = vld [vmem:[#allocation57_spill] sm:$0xff] }
 0x238   :  { %v3121_v61 = vpop.permute.xlu0 %1026  ;;  %3838 = vst [vmem:[#allocation17_spill] sm:$0xff] %v3143_v34  ;;  %v3159_v37 = vmul.f32 %v3796_v39, %v3843_v47  ;;  %v3166_v34 = vmul.f32 %v3792_v19, %v3846_v41  ;;  %v3179_v47 = vmul.f32 %v1143_v30, %v3783_v38  ;;  %v3199_v38 = vmul.f32 %v1139_v43, %v2847_v50 }
 0x239   :  { %v3123_v57 = vadd.f32 %v1257_v40, %v1170_v1  ;;  %v3125_v3 = vadd.f32 %v1258_v31, %v1171_v52  ;;  %v3127_v28 = vpop.permute.xlu1 %458  ;;  %3834 = vst [vmem:[#allocation26_spill] sm:$0xff] %v3136_v14  ;;  %v3148_v1 = vmul.f32 %v1143_v30, %v3839_v62  ;;  %v3841_v52 = vld [vmem:[#allocation33_spill] sm:$0xff]  ;;  %v3155_v31 = vmul.f32 %v1131_v13, %v2280_v44  ;;  %v3847_v62 = vld [vmem:[#allocation58_spill] sm:$0xff] }
 0x23a   :  { %v3152_v40 = vmul.f32 %v3792_v19, %v3841_v52  ;;  %v3162_v14 = vmul.f32 %v1139_v43, %v3844_v25  ;;  %v3848_v52 = vld [vmem:[#allocation59_spill] sm:$0xff]  ;;  %v3849_v44 = vld [vmem:[#allocation38_spill] sm:$0xff]  ;;  %3850 = vst [vmem:[#allocation18_spill] sm:$0xff] %v3179_v47  ;;  %v3183_v25 = vmul.f32 %v3047_v63, %v2347_v32  ;;  %3856 = vst [vmem:[#allocation23_spill] sm:$0xff] %v3199_v38 }
 0x23b   :  { %3832 = vst [vmem:[#allocation69_spill] sm:$0xff] %v3123_v57  ;;  %3840 = vst [vmem:[#allocation16_spill] sm:$0xff] %v3148_v1  ;;  %v3170_v1 = vmul.f32 %v3796_v39, %v3847_v62  ;;  %v3174_v57 = vmul.f32 %v3798_v55, %v3848_v52  ;;  %v3852_v19 = vld [vmem:[#allocation67_spill] sm:$0xff]  ;;  %v3871_v38 = vld [vmem:[#allocation52_spill] sm:$0xff] }
 0x23c   :  { %v3129_v23 = vpop.permute.xlu0 %1042  ;;  %3842 = vst [vmem:[#allocation47_spill] sm:$0xff] %v3155_v31  ;;  %3845 = vst [vmem:[#allocation15_spill] sm:$0xff] %v3162_v14  ;;  %v577_v31 = vmul.f32 %v3794_v56, %v3849_v44  ;;  %v3187_v41 = vmul.f32 %v3794_v56, %v3852_v19  ;;  %v3853_v62 = vld [vmem:[#allocation71_spill] sm:$0xff]  ;;  %v3196_v14 = vmul.f32 %v1131_v13, %v2798_v12  ;;  %v3863_v13 = vld [vmem:[#allocation32_spill] sm:$0xff] }
 0x23d   :  { %v3131_v0 = vpop.permute.xlu1 %618  ;;  %3851 = vst [vmem:[#allocation42_spill] sm:$0xff] %v3183_v25  ;;  %v3193_v52 = vmul.f32 %v3798_v55, %v3853_v62  ;;  %v3202_v44 = vmul.f32 %v1143_v30, %v2893_v10  ;;  %v3208_v56 = vmul.f32 %v3047_v63, %v2906_v59  ;;  %v3859_v19 = vld [vmem:[#allocation19_spill] sm:$0xff]  ;;  %v3861_v55 = vld [vmem:[#allocation21_spill] sm:$0xff]  ;;  %v3220_v50 = vmul.f32 %v3810_v16, %v3863_v13  ;;  %v3867_v63 = vld [vmem:[#allocation20_spill] sm:$0xff] }
 0x23e   :  { %3855 = vst [vmem:[#allocation48_spill] sm:$0xff] %v3196_v14  ;;  %v3212_v47 = vmul.f32 %v2670_v8, %v3859_v19  ;;  %v3216_v12 = vmul.f32 %v3801_v46, %v3861_v55  ;;  %v3864_v10 = vld [vmem:[#allocation31_spill] sm:$0xff]  ;;  %v3232_v62 = vmul.f32 %v3810_v16, %v3867_v63  ;;  %v3869_v19 = vld [vmem:[#allocation22_spill] sm:$0xff] }
 0x23f   :  { %3854 = vst [vmem:[#allocation43_spill] sm:$0xff] %v3193_v52  ;;  %3857 = vst [vmem:[#allocation25_spill] sm:$0xff] %v3202_v44  ;;  %v3224_v43 = vmul.f32 %v2670_v8, %v3864_v10  ;;  %v3865_v30 = vld [vmem:[#allocation35_spill] sm:$0xff]  ;;  %v3236_v55 = vmul.f32 %v3808_v58, %v3869_v19  ;;  %v3243_v8 = vmul.f32 %v2676_v21, %v3871_v38  ;;  %v3872_v10 = vld [vmem:[#allocation50_spill] sm:$0xff] }
 0x240   :  { %v3133_v27 = vpop.permute.xlu0 %436  ;;  %3858 = vst [vmem:[#allocation28_spill] sm:$0xff] %v3208_v56  ;;  %3860 = vst [vmem:[#allocation30_spill] sm:$0xff] %v3212_v47  ;;  %v3228_v59 = vmul.f32 %v3808_v58, %v3865_v30  ;;  %v1283_v13 = vld [vmem:[%s3588_s4] sm:$0xf]  ;;  %v3247_v30 = vmul.f32 %v2693_v45, %v3872_v10  ;;  %v3874_v44 = vld [vmem:[#allocation49_spill] sm:$0xff] }
 0x241   :  { %v3145_v22 = vpop.permute.xlu1 %452  ;;  %3862 = vst [vmem:[#allocation33_spill] sm:$0xff] %v3216_v12  ;;  %3868 = vst [vmem:[#allocation37_spill] sm:$0xff] %v3232_v62  ;;  %v3251_v16 = vmul.f32 %v2696_v60, %v3874_v44  ;;  %v3876_v14 = vld [vmem:[#allocation34_spill] sm:$0xff]  ;;  %v3877_v19 = vld [vmem:[#allocation51_spill] sm:$0xff] }
 0x242   :  { %3866 = vst [vmem:[#allocation36_spill] sm:$0xff] %v3228_v59  ;;  %3870 = vst [vmem:[#allocation57_spill] sm:$0xff] %v3236_v55  ;;  %v3255_v58 = vmul.f32 %v3801_v46, %v3876_v14  ;;  %v3259_v56 = vmul.f32 %v3803_v36, %v3877_v19  ;;  %v3879_v25 = vld [vmem:[#allocation54_spill] sm:$0xff]  ;;  %v3880_v55 = vld [vmem:[#allocation53_spill] sm:$0xff]  ;;  %v3284_v19 = vrot.slane %v1283_v13, %v3822_v2 }
 0x243   :  { %3873 = vst [vmem:[#allocation58_spill] sm:$0xff] %v3247_v30  ;;  %3875 = vst [vmem:[#allocation59_spill] sm:$0xff] %v3251_v16  ;;  %v3263_v38 = vmul.f32 %v2699_v49, %v3879_v25  ;;  %v3267_v10 = vmul.f32 %v3804_v48, %v3880_v55  ;;  %v3882_v59 = vld [vmem:[#allocation55_spill] sm:$0xff]  ;;  %v3884_v16 = vld [vmem:[#allocation56_spill] sm:$0xff]  ;;  %v3281_v25 = vrot.slane %v1283_v13, %v3813_v24 }
 0x244   :  { %v3189_v39 = vpop.permute.xlu0 %596  ;;  %3878 = vst [vmem:[#allocation38_spill] sm:$0xff] %v3259_v56  ;;  %v3271_v44 = vmul.f32 %v2721_v7, %v3882_v59  ;;  %v3275_v46 = vmul.f32 %v3782_v26, %v3884_v16  ;;  %v3293_v16 = vrot.slane %v1283_v13, %v3823_v4  ;;  %v3890_v2 = vld [vmem:[#allocation83_spill] sm:$0xff]  ;;  %v3894_v56 = vld [vmem:[#allocation85_spill] sm:$0xff]  ;;  %v3896_v30 = vld [vmem:[#allocation88_spill] sm:$0xff] }
 0x245   :  { %v3204_v32 = vpop.permute.xlu1 %612  ;;  %3881 = vst [vmem:[#allocation67_spill] sm:$0xff] %v3267_v10  ;;  %3886 = vst [vmem:[#allocation21_spill] sm:$0xff] %v3281_v25  ;;  %v3304_v26 = vmul.f32 %v3034_v5, %v3890_v2  ;;  %v3892_v10 = vld [vmem:[#allocation86_spill] sm:$0xff] }
 0x246   :  { %3883 = vst [vmem:[#allocation71_spill] sm:$0xff] %v3271_v44  ;;  %3885 = vst [vmem:[#allocation19_spill] sm:$0xff] %v3275_v46  ;;  %v3296_v46 = vrot.slane %v1283_v13, %v3815_v53  ;;  %v3888_v44 = vld [vmem:[#allocation84_spill] sm:$0xff]  ;;  %v3316_v53 = vmul.f32 %v3069_v11, %v3896_v30  ;;  %v3898_v13 = vld [vmem:[#allocation74_spill] sm:$0xff] }
 0x247   :  { %v3300_v24 = vmul.f32 %v3031_v29, %v3888_v44  ;;  %3891 = vst [vmem:[#allocation35_spill] sm:$0xff] %v3304_v26  ;;  %v3917_v12 = vld [vmem:[#allocation82_spill] sm:$0xff] }
 0x248   :  { %v467_v63 = vpop.permute.xlu0 %466  ;;  %3887 = vst [vmem:[#allocation32_spill] sm:$0xff] %v3296_v46  ;;  %3897 = vst [vmem:[#allocation52_spill] sm:$0xff] %v3316_v53  ;;  %v3903_v53 = vld [vmem:[#allocation60_spill] sm:$0xff]  ;;  %v3905_v46 = vld [vmem:[#allocation61_spill] sm:$0xff] }
 0x249   :  { %v451_v62 = vpop.permute.xlu1 %450  ;;  %v486_v59 = vsel %vm470_vm5, %v467_v63, %v3087_v15  ;;  %3889 = vst [vmem:[#allocation31_spill] sm:$0xff] %v3300_v24  ;;  %v3343_v5 = vmul.f32 %v3109_v54, %v3905_v46 }
 0x24a   :  { %v482_v14 = vsel %vm470_vm5, %v3087_v15, %v451_v62  ;;  %v478_v55 = vsel %vm470_vm5, %v451_v62, %v3127_v28  ;;  %v3308_v15 = vmul.f32 %v3090_v20, %v3892_v10  ;;  %v3312_v62 = vmul.f32 %v3064_v42, %v3894_v56  ;;  %v3900_v20 = vld [vmem:[#allocation75_spill] sm:$0xff] }
 0x24b   :  { %v522_v44 = vmul.f32 %v3898_v13, %v482_v14  ;;  %v474_v56 = vsel %vm470_vm5, %v3127_v28, %v467_v63  ;;  %v523_v30 = vmul.f32 %v3900_v20, %v478_v55  ;;  %v3901_v42 = vld [vmem:[#allocation87_spill] sm:$0xff]  ;;  %3906 = vst [vmem:[#allocation34_spill] sm:$0xff] %v3343_v5  ;;  %v3907_v28 = vld [vmem:[#allocation78_spill] sm:$0xff] }
 0x24c   :  { %3893 = vst [vmem:[#allocation20_spill] sm:$0xff] %v3308_v15  ;;  %3895 = vst [vmem:[#allocation22_spill] sm:$0xff] %v3312_v62  ;;  %v611_v4 = vpop.permute.xlu0 %610  ;;  %v3899_v62 = vld [vmem:[#allocation79_spill] sm:$0xff]  ;;  %v3335_v24 = vmul.f32 %v3072_v6, %v3901_v42  ;;  %v3362_v6 = vadd.f32 %v3281_v25, %v3096_v35 }
 0x24d   :  { %v636_v2 = vsel %vm628_vm4, %v611_v4, %v3131_v0  ;;  %v640_v10 = vsel %vm628_vm4, %v3102_v17, %v611_v4  ;;  %v627_v26 = vpop.permute.xlu1 %626  ;;  %v521_v15 = vmul.f32 %v3899_v62, %v486_v59  ;;  %v3339_v4 = vmul.f32 %v3106_v18, %v3903_v53  ;;  %v3908_v59 = vld [vmem:[#allocation24_spill] sm:$0xff]  ;;  %v3911_v18 = vld [vmem:[#allocation77_spill] sm:$0xff] }
 0x24e   :  { %v632_v14 = vsel %vm628_vm4, %v3131_v0, %v627_v26  ;;  %3902 = vst [vmem:[#allocation50_spill] sm:$0xff] %v3335_v24  ;;  %v681_v63 = vmul.f32 %v3907_v28, %v636_v2  ;;  %v897_v55 = vsel %vm628_vm4, %v3908_v59, %v3020_v9  ;;  %v3909_v0 = vld [vmem:[#allocation76_spill] sm:$0xff]  ;;  %v644_v42 = vsel %vm628_vm4, %v627_v26, %v3102_v17  ;;  %v3910_v24 = vld [vmem:[#allocation81_spill] sm:$0xff] }
 0x24f   :  { %3904 = vst [vmem:[#allocation49_spill] sm:$0xff] %v3339_v4  ;;  %v680_v52 = vmul.f32 %v3909_v0, %v640_v10  ;;  %v682_v53 = vmul.f32 %v3910_v24, %v632_v14  ;;  %v743_v46 = vsel %vm470_vm5, %v3911_v18, %v3094_v33  ;;  %v3912_v2 = vld [vmem:[#allocation80_spill] sm:$0xff]  ;;  %v593_v54 = vadd.f32 %v577_v31, %v522_v44  ;;  %v3913_v10 = vld [vmem:[#allocation39_spill] sm:$0xff]  ;;  %v3914_v24 = vld [vmem:[#allocation29_spill] sm:$0xff] }
 0x250   :  { %v1051_v4 = vpop.permute.xlu0 %1050  ;;  %v524_v5 = vmul.f32 %v3912_v2, %v474_v56  ;;  %v739_v26 = vsel %vm470_vm5, %v3094_v33, %v3913_v10  ;;  %v592_v17 = vadd.f32 %v3152_v40, %v521_v15  ;;  %v594_v14 = vadd.f32 %v3159_v37, %v523_v30  ;;  %v3915_v56 = vld [vmem:[#allocation41_spill] sm:$0xff]  ;;  %v3916_v44 = vld [vmem:[#allocation40_spill] sm:$0xff] }
 0x251   :  { %v1035_v29 = vpop.permute.xlu1 %1034  ;;  %v3372_v18 = vadd.f32 %v3284_v19, %v3914_v24  ;;  %v783_v31 = vmul.f32 %v2699_v49, %v3915_v56  ;;  %v3378_v35 = vmul.f32 %v3804_v48, %v3916_v44  ;;  %v697_v25 = vadd.f32 %v681_v63, %v593_v54 }
 0x252   :  { %v683_v47 = vmul.f32 %v3917_v12, %v644_v42  ;;  %v942_v33 = vmul.f32 %v2696_v60, %v897_v55  ;;  %v784_v40 = vmul.f32 %v2676_v21, %v743_v46  ;;  %v696_v15 = vadd.f32 %v680_v52, %v592_v17 }
 0x253   :  { %v698_v37 = vadd.f32 %v682_v53, %v594_v14  ;;  %v785_v24 = vmul.f32 %v3803_v36, %v739_v26  ;;  %v595_v10 = vadd.f32 %v3174_v57, %v524_v5  ;;  %v1326_v54 = vmax.f32 %v3362_v6, 0.0  ;;  %v3965_v6 = vld [vmem:[#allocation23_spill] sm:$0xff] }
 0x254   :  { %v445_v30 = vpop.permute.xlu0 %444  ;;  %v1068_v60 = vsel %vm470_vm5, %v1051_v4, %v3121_v61  ;;  %v1325_v52 = vmax.f32 %v3372_v18, 0.0  ;;  %v3396_v36 = vadd.f32 %v3293_v16, %v3125_v3  ;;  %v800_v5 = vadd.f32 %v784_v40, %v697_v25 }
 0x255   :  { %v479_v49 = vsel %vm470_vm5, %v3133_v27, %v445_v30  ;;  %v461_v48 = vpop.permute.xlu1 %460  ;;  %v699_v57 = vadd.f32 %v683_v47, %v595_v10  ;;  %v1056_v63 = vsel %vm470_vm5, %v3129_v23, %v1051_v4  ;;  %v799_v42 = vadd.f32 %v783_v31, %v696_v15 }
 0x256   :  { %v510_v21 = vmul.f32 %v3898_v13, %v479_v49  ;;  %v483_v55 = vsel %vm470_vm5, %v461_v48, %v3133_v27  ;;  %v801_v53 = vadd.f32 %v785_v24, %v698_v37  ;;  %v475_v13 = vsel %vm470_vm5, %v445_v30, %v3145_v22 }
 0x257   :  { %v509_v46 = vmul.f32 %v3899_v62, %v483_v55  ;;  %v1101_v25 = vmul.f32 %v3069_v11, %v1068_v60  ;;  %v471_v47 = vsel %vm470_vm5, %v3145_v22, %v461_v48  ;;  %v1064_v22 = vsel %vm470_vm5, %v3121_v61, %v1035_v29  ;;  %v3923_v55 = vld [vmem:[#allocation43_spill] sm:$0xff] }
 0x258   :  { %v605_v3 = vpop.permute.xlu0 %604  ;;  %v581_v17 = vadd.f32 %v3187_v41, %v510_v21  ;;  %v511_v31 = vmul.f32 %v3900_v20, %v475_v13  ;;  %v855_v40 = vadd.f32 %v3255_v58, %v800_v5  ;;  %v854_v30 = vadd.f32 %v3224_v43, %v799_v42 }
 0x259   :  { %v633_v4 = vsel %vm628_vm4, %v605_v3, %v3204_v32  ;;  %v637_v27 = vsel %vm628_vm4, %v3189_v39, %v605_v3  ;;  %v889_v26 = vpop.permute.xlu1 %888  ;;  %v580_v62 = vadd.f32 %v3166_v34, %v509_v46  ;;  %v856_v34 = vadd.f32 %v3220_v50, %v801_v53  ;;  %v3925_v46 = vld [vmem:[#allocation58_spill] sm:$0xff] }
 0x25a   :  { %v668_v14 = vmul.f32 %v3909_v0, %v637_v27  ;;  %v669_v56 = vmul.f32 %v3907_v28, %v633_v4  ;;  %v893_v44 = vsel %vm628_vm4, %v3020_v9, %v889_v26  ;;  %v512_v28 = vmul.f32 %v3912_v2, %v471_v47  ;;  %v3918_v2 = vld [vmem:[#allocation30_spill] sm:$0xff]  ;;  %v3926_v47 = vld [vmem:[#allocation59_spill] sm:$0xff] }
 0x25b   :  { %v943_v0 = vmul.f32 %v2721_v7, %v893_v44  ;;  %v3437_v24 = vadd.f32 %v942_v33, %v855_v40  ;;  %v1060_v50 = vsel %vm470_vm5, %v1035_v29, %v3129_v23  ;;  %v582_v43 = vadd.f32 %v3170_v1, %v511_v31  ;;  %v3919_v33 = vld [vmem:[#allocation33_spill] sm:$0xff]  ;;  %v3921_v29 = vld [vmem:[#allocation27_spill] sm:$0xff]  ;;  %v3922_v1 = vld [vmem:[#allocation64_spill] sm:$0xff] }
 0x25c   :  { %v684_v15 = vadd.f32 %v668_v14, %v580_v62  ;;  %v685_v41 = vadd.f32 %v669_v56, %v581_v17  ;;  %v865_v37 = vpop.permute.xlu0 %864  ;;  %v1104_v23 = vmul.f32 %v3921_v29, %v1056_v63  ;;  %v1102_v5 = vmul.f32 %v3922_v1, %v1064_v22  ;;  %v3927_v62 = vld [vmem:[#allocation63_spill] sm:$0xff]  ;;  %v3928_v63 = vld [vmem:[#allocation69_spill] sm:$0xff]  ;;  %v3929_v31 = vld [vmem:[#allocation32_spill] sm:$0xff] }
 0x25d   :  { %v901_v20 = vsel %vm628_vm4, %v865_v37, %v3908_v59  ;;  %v621_v61 = vpop.permute.xlu1 %620  ;;  %v3441_v10 = vadd.f32 %v943_v0, %v856_v34  ;;  %v802_v17 = vadd.f32 %v3378_v35, %v699_v57  ;;  %v1117_v14 = vadd.f32 %v1101_v25, %v3927_v62  ;;  %v3930_v44 = vld [vmem:[#allocation52_spill] sm:$0xff]  ;;  %v3932_v0 = vld [vmem:[#allocation31_spill] sm:$0xff] }
 0x25e   :  { %v787_v9 = vadd.f32 %v3263_v38, %v684_v15  ;;  %v788_v58 = vadd.f32 %v3243_v8, %v685_v41  ;;  %v941_v7 = vmul.f32 %v2693_v45, %v901_v20  ;;  %v629_v59 = vsel %vm628_vm4, %v3204_v32, %v621_v61  ;;  %v3920_v45 = vld [vmem:[#allocation81_spill] sm:$0xff]  ;;  %v3931_v15 = vld [vmem:[#allocation38_spill] sm:$0xff]  ;;  %v3934_v35 = vld [vmem:[#allocation44_spill] sm:$0xff] }
 0x25f   :  { %v641_v38 = vsel %vm628_vm4, %v621_v61, %v3189_v39  ;;  %v670_v60 = vmul.f32 %v3920_v45, %v629_v59  ;;  %v583_v32 = vadd.f32 %v3923_v55, %v512_v28  ;;  %v3924_v39 = vld [vmem:[#allocation45_spill] sm:$0xff]  ;;  %v3472_v22 = vadd.f32 %v3929_v31, %v3928_v63  ;;  %v3935_v25 = vld [vmem:[#allocation67_spill] sm:$0xff]  ;;  %v3948_v63 = vld [vmem:[#allocation42_spill] sm:$0xff] }
 0x260   :  { %v842_v8 = vadd.f32 %v3918_v2, %v787_v9  ;;  %v843_v49 = vadd.f32 %v3919_v33, %v788_v58  ;;  %v3456_v48 = vadd.f32 %v941_v7, %v854_v30  ;;  %v3459_v21 = vpop.permute.xlu0 %1028  ;;  %v671_v42 = vmul.f32 %v3917_v12, %v641_v38  ;;  %v3933_v30 = vld [vmem:[#allocation62_spill] sm:$0xff]  ;;  %v3939_v2 = vld [vmem:[#allocation36_spill] sm:$0xff]  ;;  %v3940_v33 = vld [vmem:[#allocation73_spill] sm:$0xff] }
 0x261   :  { %v1201_v53 = vpop.permute.xlu1 %1200  ;;  %v1103_v13 = vmul.f32 %v3924_v39, %v1060_v50  ;;  %v686_v27 = vadd.f32 %v670_v60, %v582_v43  ;;  %v905_v12 = vsel %vm628_vm4, %v889_v26, %v865_v37  ;;  %v1120_v20 = vadd.f32 %v1104_v23, %v3933_v30  ;;  %v3936_v7 = vld [vmem:[#allocation46_spill] sm:$0xff]  ;;  %v3938_v26 = vld [vmem:[#allocation37_spill] sm:$0xff]  ;;  %v3943_v55 = vld [vmem:[#allocation71_spill] sm:$0xff] }
 0x262   :  { %v945_v3 = vadd.f32 %v3925_v46, %v842_v8  ;;  %v946_v4 = vadd.f32 %v3926_v47, %v843_v49  ;;  %v687_v56 = vadd.f32 %v671_v42, %v583_v32  ;;  %v1118_v57 = vadd.f32 %v1102_v5, %v3934_v35  ;;  %v3937_v43 = vld [vmem:[#allocation26_spill] sm:$0xff]  ;;  %v3941_v45 = vld [vmem:[#allocation57_spill] sm:$0xff]  ;;  %v3947_v62 = vld [vmem:[#allocation19_spill] sm:$0xff] }
 0x263   :  { %v789_v41 = vadd.f32 %v3931_v15, %v686_v27  ;;  %v1119_v50 = vadd.f32 %v1103_v13, %v3936_v7  ;;  %v857_v8 = vadd.f32 %v3939_v2, %v802_v17  ;;  %v944_v49 = vmul.f32 %v3940_v33, %v905_v12  ;;  %v3942_v23 = vld [vmem:[#allocation17_spill] sm:$0xff]  ;;  %v3945_v13 = vld [vmem:[#allocation66_spill] sm:$0xff]  ;;  %v3949_v17 = vld [vmem:[#allocation47_spill] sm:$0xff] }
 0x264   :  { %v1109_v40 = vadd.f32 %v3930_v44, %v945_v3  ;;  %v1193_v34 = vpop.permute.xlu0 %1192  ;;  %v1110_v28 = vadd.f32 %v3932_v0, %v946_v4  ;;  %v790_v61 = vadd.f32 %v3935_v25, %v687_v56  ;;  %v3944_v42 = vld [vmem:[#allocation65_spill] sm:$0xff]  ;;  %v3946_v4 = vld [vmem:[#allocation20_spill] sm:$0xff]  ;;  %v1173_v44 = vadd.f32 %v3948_v63, %v1118_v57  ;;  %v3950_v15 = vld [vmem:[#allocation22_spill] sm:$0xff] }
 0x265   :  { %v1218_v9 = vsel %vm628_vm4, %v1193_v34, %v1201_v53  ;;  %v1185_v58 = vpop.permute.xlu1 %1184  ;;  %v844_v37 = vadd.f32 %v3938_v26, %v789_v41  ;;  %v960_v25 = vadd.f32 %v944_v49, %v857_v8  ;;  %v3953_v7 = vld [vmem:[#allocation21_spill] sm:$0xff]  ;;  %v3956_v2 = vld [vmem:[#allocation70_spill] sm:$0xff] }
 0x266   :  { %v1164_v59 = vadd.f32 %v3937_v43, %v1109_v40  ;;  %v1222_v38 = vsel %vm628_vm4, %v1185_v58, %v1193_v34  ;;  %v845_v60 = vadd.f32 %v3941_v45, %v790_v61  ;;  %v1165_v5 = vadd.f32 %v3942_v23, %v1110_v28  ;;  %v3951_v34 = vld [vmem:[#allocation35_spill] sm:$0xff]  ;;  %v3952_v61 = vld [vmem:[#allocation18_spill] sm:$0xff] }
 0x267   :  { %v947_v32 = vadd.f32 %v3943_v55, %v844_v37  ;;  %v1260_v46 = vmul.f32 %v3944_v42, %v1218_v9  ;;  %v1259_v3 = vmul.f32 %v3945_v13, %v1222_v38  ;;  %v1172_v40 = vadd.f32 %v3949_v17, %v1117_v14  ;;  %v3954_v43 = vld [vmem:[#allocation50_spill] sm:$0xff] }
 0x268   :  { %v1045_v47 = vpop.permute.xlu0 %1044  ;;  %v1267_v27 = vadd.f32 %v3946_v4, %v1164_v59  ;;  %v948_v56 = vadd.f32 %v3947_v62, %v845_v60  ;;  %v1268_v41 = vadd.f32 %v3950_v15, %v1165_v5  ;;  %v1175_v9 = vadd.f32 %v3952_v61, %v1120_v20  ;;  %v3955_v59 = vld [vmem:[#allocation68_spill] sm:$0xff] }
 0x269   :  { %v1209_v12 = vpop.permute.xlu1 %1208  ;;  %v1111_v0 = vadd.f32 %v3951_v34, %v947_v32  ;;  %v1276_v37 = vadd.f32 %v1260_v46, %v1173_v44  ;;  %v1275_v38 = vadd.f32 %v1259_v3, %v1172_v40  ;;  %v3959_v44 = vld [vmem:[#allocation49_spill] sm:$0xff] }
 0x26a   :  { %v1214_v28 = vsel %vm628_vm4, %v1201_v53, %v1209_v12  ;;  %v1226_v30 = vsel %vm628_vm4, %v1209_v12, %v1185_v58  ;;  %v1305_v35 = vadd.f32 %v3284_v19, %v1267_v27  ;;  %v1306_v57 = vadd.f32 %v3953_v7, %v1268_v41  ;;  %v3957_v53 = vld [vmem:[#allocation72_spill] sm:$0xff] }
 0x26b   :  { %v1112_v14 = vadd.f32 %v3954_v43, %v948_v56  ;;  %v1166_v26 = vadd.f32 %v3955_v59, %v1111_v0  ;;  %v1261_v33 = vmul.f32 %v3956_v2, %v1214_v28  ;;  %v1262_v60 = vmul.f32 %v3957_v53, %v1226_v30  ;;  %v3958_v27 = vld [vmem:[#allocation16_spill] sm:$0xff] }
 0x26c   :  { %v1053_v45 = vpop.permute.xlu0 %1052  ;;  %v1321_v49 = vmax.f32 %v1305_v35, 0.0  ;;  %v1322_v4 = vmax.f32 %v1306_v57, 0.0  ;;  %v1314_v17 = vadd.f32 %v3953_v7, %v1276_v37  ;;  %v1313_v0 = vadd.f32 %v3284_v19, %v1275_v38  ;;  %v3964_v57 = vld [vmem:[#allocation25_spill] sm:$0xff] }
 0x26d   :  { %v1057_v58 = vsel %vm470_vm5, %v1045_v47, %v1053_v45  ;;  %v1069_v20 = vsel %vm470_vm5, %v1053_v45, %v3459_v21  ;;  %v1037_v8 = vpop.permute.xlu1 %1036  ;;  %v1167_v62 = vadd.f32 %v3958_v27, %v1112_v14  ;;  %v1278_v41 = vadd.f32 %v1262_v60, %v1175_v9 }
 0x26e   :  { %v1105_v23 = vmul.f32 %v3069_v11, %v1069_v20  ;;  %v1108_v5 = vmul.f32 %v3921_v29, %v1057_v58  ;;  %v1061_v55 = vsel %vm470_vm5, %v1037_v8, %v1045_v47  ;;  %v1065_v32 = vsel %vm470_vm5, %v3459_v21, %v1037_v8  ;;  %v3960_v47 = vld [vmem:[#allocation15_spill] sm:$0xff]  ;;  %1472 = vmatprep.mubr.f32.mxu0 %v1322_v4 }
 0x26f   :  { %v1106_v46 = vmul.f32 %v3922_v1, %v1065_v32  ;;  %v1107_v3 = vmul.f32 %v3924_v39, %v1061_v55  ;;  %v1269_v29 = vadd.f32 %v3959_v44, %v1166_v26  ;;  %v1174_v40 = vadd.f32 %v3960_v47, %v1119_v50  ;;  %v3961_v39 = vld [vmem:[#allocation34_spill] sm:$0xff]  ;;  %1473 = vmatmul.mubr.f32.vlgmr.msra.gmra.mrb[8].mxu0 %v1321_v49 }
 0x270   :  { %v1121_v56 = vadd.f32 %v1105_v23, %v3456_v48  ;;  %v1124_v63 = vadd.f32 %v1108_v5, %v960_v25  ;;  %v1195_v11 = vpop.permute.xlu0 %1194  ;;  %v1270_v15 = vadd.f32 %v3961_v39, %v1167_v62  ;;  %1477 = vmatprep.mubr.f32.mxu0 %v1326_v54  ;;  %v3963_v25 = vld [vmem:[#allocation48_spill] sm:$0xff]  ;;  %v1330_v14 = vmax.f32 %v1314_v17, 0.0 }
 0x271   :  { %v1122_v12 = vadd.f32 %v1106_v46, %v3437_v24  ;;  %v1123_v21 = vadd.f32 %v1107_v3, %v3441_v10  ;;  %v1203_v1 = vpop.permute.xlu1 %1202  ;;  %v1307_v34 = vadd.f32 %v3929_v31, %v1269_v29  ;;  %v1277_v28 = vadd.f32 %v1261_v33, %v1174_v40  ;;  %v3962_v24 = vld [vmem:[#allocation28_spill] sm:$0xff] }
 0x272   :  { %v1219_v48 = vsel %vm628_vm4, %v1195_v11, %v1203_v1  ;;  %v1308_v30 = vadd.f32 %v3293_v16, %v1270_v15  ;;  %v1176_v61 = vadd.f32 %v3963_v25, %v1121_v56  ;;  %v1179_v43 = vadd.f32 %v3964_v57, %v1124_v63  ;;  %v1833_v15 = vld [vmem:[#allocation2] sm:$0xff] }
 0x273   :  { %v1177_v50 = vadd.f32 %v3962_v24, %v1122_v12  ;;  %v1264_v10 = vmul.f32 %v3944_v42, %v1219_v48  ;;  %v1323_v35 = vmax.f32 %v1307_v34, 0.0  ;;  %v1178_v54 = vadd.f32 %v3965_v6, %v1123_v21  ;;  %1478 = vmatmul.mubr.f32.gmra.mrb[10].mxu0 %v1325_v52 }
 0x274   :  { %v1187_v9 = vpop.permute.xlu0 %1186  ;;  %v1324_v26 = vmax.f32 %v1308_v30, 0.0  ;;  %v1316_v60 = vadd.f32 %v3293_v16, %v1278_v41  ;;  %v1328_v58 = vmax.f32 %v3396_v36, 0.0  ;;  %1482 = vmatprep.mubr.f32.mxu0 %v1330_v14  ;;  %v1327_v5 = vmax.f32 %v3472_v22, 0.0 }
 0x275   :  { %v1280_v59 = vadd.f32 %v1264_v10, %v1177_v50  ;;  %v1223_v37 = vsel %vm628_vm4, %v1187_v9, %v1195_v11  ;;  %v1211_v38 = vpop.permute.xlu1 %1210  ;;  %v1315_v55 = vadd.f32 %v3929_v31, %v1277_v28 }
 0x276   :  { %v1263_v42 = vmul.f32 %v3945_v13, %v1223_v37  ;;  %v1215_v33 = vsel %vm628_vm4, %v1203_v1, %v1211_v38  ;;  %v1227_v45 = vsel %vm628_vm4, %v1211_v38, %v1187_v9  ;;  %1557 = vmatprep.mubr.f32.mxu1 %v1324_v26  ;;  %v1329_v13 = vmax.f32 %v1313_v0, 0.0 }
 0x277   :  { %v1265_v20 = vmul.f32 %v3956_v2, %v1215_v33  ;;  %v1266_v8 = vmul.f32 %v3957_v53, %v1227_v45  ;;  %v1318_v18 = vadd.f32 %v3953_v7, %v1280_v59  ;;  %1558 = vmatmul.mubr.f32.vlgmr.msra.gmra.mrb[8].mxu1 %v1323_v35  ;;  %v1332_v2 = vmax.f32 %v1316_v60, 0.0  ;;  %v1834_v35 = vld [vmem:[#allocation2 + $0x8] sm:$0xff]  ;;  %v1835_v59 = vld [vmem:[#allocation2 + $0x10] sm:$0xff] }
 0x278   :  { %v1279_v52 = vadd.f32 %v1263_v42, %v1176_v61  ;;  %1562 = vmatprep.mubr.f32.mxu1 %v1328_v58  ;;  %1483 = vmatmul.mubr.f32.gmra.mrb[12].mxu0 %v1329_v13  ;;  %v1331_v3 = vmax.f32 %v1315_v55, 0.0 }
 0x279   :  { %v1281_v49 = vadd.f32 %v1265_v20, %v1178_v54  ;;  %v1282_v23 = vadd.f32 %v1266_v8, %v1179_v43  ;;  %v1334_v51 = vmax.f32 %v1318_v18, 0.0  ;;  %v1836_v54 = vld [vmem:[#allocation2 + $0x18] sm:$0xff] }
 0x27a   :  { %v1317_v36 = vadd.f32 %v3284_v19, %v1279_v52 }
 0x27b   :  { %1487 = vmatprep.mubr.f32.mxu0 %v1334_v51  ;;  %v1320_v53 = vadd.f32 %v3293_v16, %v1282_v23  ;;  %1563 = vmatmul.mubr.f32.gmra.mrb[10].mxu1 %v1327_v5  ;;  %v1319_v32 = vadd.f32 %v3929_v31, %v1281_v49  ;;  %v1605_v16 = vld [vmem:[%s3590_s6] ss:$0 sm:$0xff]  ;;  %s1965_s6 = smov [#allocation10]  }
 0x27c   :  { %v1333_v7 = vmax.f32 %v1317_v36, 0.0  ;;  %1567 = vmatprep.mubr.f32.mxu1 %v1332_v2  ;;  %s1591_s9 = sshll.u32 %s1965_s6, 4  ;;  %s1592_s9 = int_to_ptr.vmem [resolvable:$true] %s1591_s9 }
 0x27d   :  { %v1336_v46 = vmax.f32 %v1320_v53, 0.0  ;;  %v1335_v4 = vmax.f32 %v1319_v32, 0.0  ;;  %s1925_s10 = scalar_lea.vmem %s1592_s9, 512  ;;  %p1930_p5 = scmp.lt.s32.totalorder %s1592_s9, %s1592_s9 }
 0x27e   :  { %1488 = vmatmul.mubr.f32.gmra.mrb[14].mxu0 %v1333_v7  ;;  %p1926_p4 = scmp.ne.s32.totalorder %s1592_s9, %s1925_s10  ;;  %p1931_p6 = scmp.lt.s32.totalorder %s1925_s10, %s1925_s10 }
 0x27f   :  { %1568 = vmatmul.mubr.f32.gmra.mrb[12].mxu1 %v1331_v3 }
 0x280   :  { %1572 = vmatprep.mubr.f32.mxu1 %v1336_v46  ;;  %p1932_p7 = por %p1931_p6, %p1930_p5 }
 0x282   :  { %p1933_p8 = pnand %p1932_p7, %p1926_p4 }
 0x283   :  { %1573 = vmatmul.mubr.f32.gmra.mrb[14].mxu1 %v1335_v4 }
 0x342   :  { %v1638_v22 = vpop.f32.mrb[8].mxu0 }
 0x343   :  { %v1639_v27 = vpop.f32.mrb[9].mxu0 }
 0x344   :  { %v1640_v62 = vadd.f32 %v1639_v27, %v1638_v22 }
 0x346   :  { %v1641_v19 = vpop.f32.mrb[10].mxu0  ;;  %v1475_v44 = vadd.f32 %v1640_v62, %v1605_v16 }
 0x347   :  { %v1642_v56 = vpop.f32.mrb[11].mxu0 }
 0x348   :  { %v1643_v11 = vadd.f32 %v1642_v56, %v1641_v19 }
 0x34a   :  { %v1682_v63 = vpop.f32.mrb[8].mxu1  ;;  %v1480_v39 = vadd.f32 %v1643_v11, %v1605_v16 }
 0x34b   :  { %v1683_v31 = vpop.f32.mrb[9].mxu1  ;;  %v1644_v17 = vpop.f32.mrb[12].mxu0 }
 0x34c   :  { %v1684_v29 = vadd.f32 %v1683_v31, %v1682_v63  ;;  %v1645_v47 = vpop.f32.mrb[13].mxu0 }
 0x34d   :  { %v1646_v21 = vadd.f32 %v1645_v47, %v1644_v17 }
 0x34e   :  { %v1560_v40 = vadd.f32 %v1684_v29, %v1475_v44  ;;  %v1685_v12 = vpop.f32.mrb[10].mxu1 }
 0x34f   :  { %v1686_v1 = vpop.f32.mrb[11].mxu1  ;;  %v1485_v30 = vadd.f32 %v1646_v21, %v1605_v16 }
 0x350   :  { %v1578_v41 = vadd.f32 %v1833_v15, %v1560_v40  ;;  %v1687_v48 = vadd.f32 %v1686_v1, %v1685_v12 }
 0x351   :  { %v1647_v34 = vpop.f32.mrb[14].mxu0 }
 0x352   :  { %v1648_v0 = vpop.f32.mrb[15].mxu0  ;;  %1582 = vst [vmem:[#allocation10] sm:$0xff] %v1578_v41  ;;  %v1565_v28 = vadd.f32 %v1687_v48, %v1480_v39  ;;  %v1688_v24 = vpop.f32.mrb[12].mxu1 }
 0x353   :  { %v1649_v50 = vadd.f32 %v1648_v0, %v1647_v34  ;;  %v1689_v10 = vpop.f32.mrb[13].mxu1 }
 0x354   :  { %v1579_v25 = vadd.f32 %v1834_v35, %v1565_v28  ;;  %v1690_v61 = vadd.f32 %v1689_v10, %v1688_v24 }
 0x355   :  { %v1490_v57 = vadd.f32 %v1649_v50, %v1605_v16 }
 0x356   :  { %1583 = vst [vmem:[#allocation10 + $0x8] sm:$0xff] %v1579_v25  ;;  %v1570_v9 = vadd.f32 %v1690_v61, %v1485_v30  ;;  %v1691_v43 = vpop.f32.mrb[14].mxu1 }
 0x357   :  { %v1692_v14 = vpop.f32.mrb[15].mxu1 }
 0x358   :  { %v1580_v26 = vadd.f32 %v1835_v59, %v1570_v9  ;;  %v1693_v37 = vadd.f32 %v1692_v14, %v1691_v43 }
 0x35a   :  { %1584 = vst [vmem:[#allocation10 + $0x10] sm:$0xff] %v1580_v26  ;;  %v1575_v6 = vadd.f32 %v1693_v37, %v1490_v57 }
 0x35c   :  { %v1581_v38 = vadd.f32 %v1836_v54, %v1575_v6 }
 0x35e   :  { %1585 = vst [vmem:[#allocation10 + $0x18] sm:$0xff] %v1581_v38 }
 0x35f   :  { %1936 = shalt.err (!%p1933_p8)
}
 0x360   :  { %s1937_s15 = scalar_lea.hbm %s3591_s7, 512 }
 0x361   :  { %p1938_p9 = scmp.ne.s32.totalorder %s3591_s7, %s1937_s15  ;;  %p1941_p10 = scmp.lt.u32.totalorder %s1937_s15, %s3591_s7 }
 0x363   :  { %p1943_p11 = pnand %p1941_p10, %p1938_p9 }
 0x365   :  { %1946 = shalt.err (!%p1943_p11)
}
 0x366   :  { %1597 = dma.vmem_to_hbm [thread:$0]  %s1592_s9, 512, %s3591_s7, [#allocation4], %s1959_s1, %s1959_s1, %s1960_s25  }
 0x367   :  { %1953 = dma.done.wait [#allocation4], 512  }
 0x368   :  { %1954 = vsyncadd [#allocation4], 4294966784 }
 0x369   :  { %1601 = vsyncpa [#allocation3], 1 }
 0x36a   :  { %1602 = vsyncpa [#allocation6], 1 }
 0x36b   :  { %1603 = vsyncpa [#allocation9], 1 }
 0x36c   :  { %1604 = vsyncpa [#allocation4], 1 }

</bundles_post_ra>
